<compile_context>
chip_gen: v7x
topology: tpu7x:2x2x1
jax: 0.10.0
libtpu: 0.0.40
codegen_flags: <defaults>
</compile_context>

<pallas_src>
import functools

import jax
import jax.numpy as jnp
from jax.experimental import pallas as pl
from jax.experimental.pallas import tpu as pltpu

D_IN = 28 * 28       # 784
HID = 512
D_OUT = 10
D_OUT_PAD = 128      # lane-dense output width (sliced back to 10 outside the kernel)


def _round_up(n, m):
    return ((n + m - 1) // m) * m


def mlp_kernel(x_ref, w1_ref, b1_ref, w2_ref, b2_ref, w3_ref, b3_ref, o_ref):
    # x_ref: (TB, 784) f32 activations; cast to bf16 in-kernel (hidden under MXU work).
    # wN bf16, bN f32 shaped (1, N) so they broadcast over the batch tile.
    x = x_ref[...].astype(jnp.bfloat16)
    h1 = jnp.dot(x, w1_ref[...], preferred_element_type=jnp.float32) + b1_ref[...]
    h1 = jnp.maximum(h1, 0.0)
    h2 = jnp.dot(h1.astype(jnp.bfloat16), w2_ref[...],
                 preferred_element_type=jnp.float32) + b2_ref[...]
    h2 = jnp.maximum(h2, 0.0)
    logits = jnp.dot(h2.astype(jnp.bfloat16), w3_ref[...],
                     preferred_element_type=jnp.float32) + b3_ref[...]
    o_ref[...] = logits.astype(o_ref.dtype)   # (TB, 128) lane-dense store


def prepare_params(params):
    """One-time layout/dtype prep, hoisted out of the per-call path:
    bf16 weights for the MXU, w3/b3 zero-padded to a lane-dense 128-wide output."""
    w1, b1, w2, b2, w3, b3 = params
    w1p = w1.astype(jnp.bfloat16)                                          # (784, 512)
    w2p = w2.astype(jnp.bfloat16)                                          # (512, 512)
    w3p = jnp.zeros((HID, D_OUT_PAD), jnp.bfloat16).at[:, :D_OUT].set(
        w3.astype(jnp.bfloat16))                                           # (512, 128)
    b1p = b1.reshape(1, HID).astype(jnp.float32)
    b2p = b2.reshape(1, HID).astype(jnp.float32)
    b3p = jnp.zeros((1, D_OUT_PAD), jnp.float32).at[:, :D_OUT].set(
        b3.reshape(1, D_OUT).astype(jnp.float32))
    return (w1p, b1p, w2p, b2p, w3p, b3p)


@jax.jit
def neural_network_forward(x, prepared):
    """x: (B, 1, 28, 28) float32 NCHW. prepared: output of prepare_params.
    Returns (B, 10) float32 logits."""
    w1p, b1p, w2p, b2p, w3p, b3p = prepared
    B = x.shape[0]
    x_flat = x.reshape(B, D_IN)                      # nn.Flatten (metadata-only reshape)

    # Batch tiling policy (see header): small batches -> 16-row tile, large -> 256.
    TB = min(256, _round_up(B, 16))
    B_pad = _round_up(B, TB)
    if B_pad != B:                                   # only copies when B isn't a tile multiple
        x_flat = jnp.pad(x_flat, ((0, B_pad - B), (0, 0)))

    n_tiles = B_pad // TB
    flops = 2 * B_pad * (D_IN * HID + HID * HID + HID * D_OUT_PAD)
    bytes_accessed = (
        (w1p.size + w2p.size + w3p.size) * 2
        + (b1p.size + b2p.size + b3p.size) * 4
        + B_pad * D_IN * 4                # f32 activations in
        + B_pad * D_OUT_PAD * 4           # f32 logits out
    )

    out = pl.pallas_call(
        mlp_kernel,
        out_shape=jax.ShapeDtypeStruct((B_pad, D_OUT_PAD), jnp.float32),
        grid=(n_tiles,),
        in_specs=[
            pl.BlockSpec((TB, D_IN), lambda i: (i, 0)),      # activations: tiled over batch
            pl.BlockSpec((D_IN, HID), lambda i: (0, 0)),     # weights/biases VMEM-resident
            pl.BlockSpec((1, HID), lambda i: (0, 0)),
            pl.BlockSpec((HID, HID), lambda i: (0, 0)),
            pl.BlockSpec((1, HID), lambda i: (0, 0)),
            pl.BlockSpec((HID, D_OUT_PAD), lambda i: (0, 0)),
            pl.BlockSpec((1, D_OUT_PAD), lambda i: (0, 0)),
        ],
        out_specs=pl.BlockSpec((TB, D_OUT_PAD), lambda i: (i, 0)),
        compiler_params=pltpu.CompilerParams(
            dimension_semantics=("parallel",),   # batch tiles shard across v7x dual TCs
        ),
        cost_estimate=pl.CostEstimate(
            flops=flops, transcendentals=0, bytes_accessed=bytes_accessed),
    )(x_flat, w1p, b1p, w2p, b2p, w3p, b3p)

    return out[:B, :D_OUT]


def init_params(key):
    """nn.Linear-style init: U(-1/sqrt(fan_in), 1/sqrt(fan_in)).
    Weights stored (in, out) so the kernel does x @ W (== torch's x @ W.T)."""
    def linear(key, fan_in, fan_out):
        kw, kb = jax.random.split(key)
        bound = 1.0 / jnp.sqrt(fan_in)
        w = jax.random.uniform(kw, (fan_in, fan_out), jnp.float32, -bound, bound)
        b = jax.random.uniform(kb, (1, fan_out), jnp.float32, -bound, bound)
        return w, b

    k1, k2, k3 = jax.random.split(key, 3)
    w1, b1 = linear(k1, D_IN, HID)
    w2, b2 = linear(k2, HID, HID)
    w3, b3 = linear(k3, HID, D_OUT)
    return (w1, b1, w2, b2, w3, b3)


if __name__ == "__main__":
    key = jax.random.PRNGKey(0)
    k_params, k_x = jax.random.split(key)

    params = init_params(k_params)
    prepared = prepare_params(params)   # one-time weight layout / bf16 cast, reused per call

    # Small batch of "images": (B=2, C=1, H=28, W=28), NCHW like PyTorch.
    x = jax.random.normal(k_x, (2, 1, 28, 28), dtype=jnp.float32)

    out = neural_network_forward(x, prepared)
    out = jax.block_until_ready(out)

    # Reference: same forward in plain JAX using the same bf16 MXU inputs / f32 accumulation.
    w1, b1, w2, b2, w3, b3 = params
    xf = x.reshape(x.shape[0], -1).astype(jnp.bfloat16)
    w1b, w2b, w3b = (w.astype(jnp.bfloat16) for w in (w1, w2, w3))
    h = jnp.maximum(jnp.dot(xf, w1b, preferred_element_type=jnp.float32) + b1, 0.0)
    h = jnp.maximum(jnp.dot(h.astype(jnp.bfloat16), w2b,
                            preferred_element_type=jnp.float32) + b2, 0.0)
    ref = jnp.dot(h.astype(jnp.bfloat16), w3b, preferred_element_type=jnp.float32) + b3

    assert out.shape == (2, 10)
    assert jnp.allclose(out, ref, atol=1e-2, rtol=1e-2), (out, ref)

    print("KERNEL_OK")
</pallas_src>

<mosaic_0001>
module attributes {stable_mosaic.version = 11 : i64} {
  func.func @mlp_kernel(%arg0: i32, %arg1: memref<16x784xf32, #tpu.memory_space<vmem>>, %arg2: memref<784x512xbf16, #tpu.memory_space<vmem>>, %arg3: memref<1x512xf32, #tpu.memory_space<vmem>>, %arg4: memref<512x512xbf16, #tpu.memory_space<vmem>>, %arg5: memref<1x512xf32, #tpu.memory_space<vmem>>, %arg6: memref<512x128xbf16, #tpu.memory_space<vmem>>, %arg7: memref<1x128xf32, #tpu.memory_space<vmem>>, %arg8: memref<16x128xf32, #tpu.memory_space<vmem>>) attributes {dimension_semantics = [#tpu.dimension_semantics<parallel>], iteration_bounds = array<i64: 1>, scalar_prefetch = 0 : i64, scratch_operands = 0 : i64, tpu.core_type = #tpu.core_type<tc>, window_params = [{transform_indices = @transform_0, window_bounds = array<i64: 16, 784>}, {pipeline_mode = #tpu.pipeline_mode<synchronous>, transform_indices = @transform_1, window_bounds = array<i64: 784, 512>}, {pipeline_mode = #tpu.pipeline_mode<synchronous>, transform_indices = @transform_2, window_bounds = array<i64: 1, 512>}, {pipeline_mode = #tpu.pipeline_mode<synchronous>, transform_indices = @transform_3, window_bounds = array<i64: 512, 512>}, {pipeline_mode = #tpu.pipeline_mode<synchronous>, transform_indices = @transform_4, window_bounds = array<i64: 1, 512>}, {pipeline_mode = #tpu.pipeline_mode<synchronous>, transform_indices = @transform_5, window_bounds = array<i64: 512, 128>}, {pipeline_mode = #tpu.pipeline_mode<synchronous>, transform_indices = @transform_6, window_bounds = array<i64: 1, 128>}, {transform_indices = @transform_7, window_bounds = array<i64: 16, 128>}]} {
    %c0 = arith.constant 0 : index
    %c0_0 = arith.constant 0 : index
    %0 = vector.load %arg1[%c0, %c0_0] : memref<16x784xf32, #tpu.memory_space<vmem>>, vector<16x784xf32>
    %1 = arith.truncf %0 : vector<16x784xf32> to vector<16x784xbf16>
    %c0_1 = arith.constant 0 : index
    %c0_2 = arith.constant 0 : index
    %2 = vector.load %arg2[%c0_1, %c0_2] : memref<784x512xbf16, #tpu.memory_space<vmem>>, vector<784x512xbf16>
    %cst = arith.constant dense<0.000000e+00> : vector<16x512xf32>
    %3 = tpu.matmul %1, %2, %cst {dimension_numbers = #tpu.dot_dimension_numbers<[1], [0], [0], [1], [0, 0, 1, 1], [], []>} : vector<16x784xbf16>, vector<784x512xbf16>, vector<16x512xf32> -> vector<16x512xf32>
    %c0_3 = arith.constant 0 : index
    %c0_4 = arith.constant 0 : index
    %4 = vector.load %arg3[%c0_3, %c0_4] : memref<1x512xf32, #tpu.memory_space<vmem>>, vector<1x512xf32>
    %5 = vector.broadcast %4 : vector<1x512xf32> to vector<16x512xf32>
    %6 = arith.addf %3, %5 : vector<16x512xf32>
    %cst_5 = arith.constant 0.000000e+00 : f32
    %7 = vector.broadcast %cst_5 : f32 to vector<16x512xf32>
    %8 = arith.maximumf %6, %7 : vector<16x512xf32>
    %9 = arith.truncf %8 : vector<16x512xf32> to vector<16x512xbf16>
    %c0_6 = arith.constant 0 : index
    %c0_7 = arith.constant 0 : index
    %10 = vector.load %arg4[%c0_6, %c0_7] : memref<512x512xbf16, #tpu.memory_space<vmem>>, vector<512x512xbf16>
    %cst_8 = arith.constant dense<0.000000e+00> : vector<16x512xf32>
    %11 = tpu.matmul %9, %10, %cst_8 {dimension_numbers = #tpu.dot_dimension_numbers<[1], [0], [0], [1], [0, 0, 1, 1], [], []>} : vector<16x512xbf16>, vector<512x512xbf16>, vector<16x512xf32> -> vector<16x512xf32>
    %c0_9 = arith.constant 0 : index
    %c0_10 = arith.constant 0 : index
    %12 = vector.load %arg5[%c0_9, %c0_10] : memref<1x512xf32, #tpu.memory_space<vmem>>, vector<1x512xf32>
    %13 = vector.broadcast %12 : vector<1x512xf32> to vector<16x512xf32>
    %14 = arith.addf %11, %13 : vector<16x512xf32>
    %cst_11 = arith.constant 0.000000e+00 : f32
    %15 = vector.broadcast %cst_11 : f32 to vector<16x512xf32>
    %16 = arith.maximumf %14, %15 : vector<16x512xf32>
    %17 = arith.truncf %16 : vector<16x512xf32> to vector<16x512xbf16>
    %c0_12 = arith.constant 0 : index
    %c0_13 = arith.constant 0 : index
    %18 = vector.load %arg6[%c0_12, %c0_13] : memref<512x128xbf16, #tpu.memory_space<vmem>>, vector<512x128xbf16>
    %cst_14 = arith.constant dense<0.000000e+00> : vector<16x128xf32>
    %19 = tpu.matmul %17, %18, %cst_14 {dimension_numbers = #tpu.dot_dimension_numbers<[1], [0], [0], [1], [0, 0, 1, 1], [], []>} : vector<16x512xbf16>, vector<512x128xbf16>, vector<16x128xf32> -> vector<16x128xf32>
    %c0_15 = arith.constant 0 : index
    %c0_16 = arith.constant 0 : index
    %20 = vector.load %arg7[%c0_15, %c0_16] : memref<1x128xf32, #tpu.memory_space<vmem>>, vector<1x128xf32>
    %21 = vector.broadcast %20 : vector<1x128xf32> to vector<16x128xf32>
    %22 = arith.addf %19, %21 : vector<16x128xf32>
    %c0_17 = arith.constant 0 : index
    %c0_18 = arith.constant 0 : index
    %23 = vector.load %arg8[%c0_17, %c0_18] : memref<16x128xf32, #tpu.memory_space<vmem>>, vector<16x128xf32>
    tpu.vector_store %arg8[%c0_17, %c0_18], %22 {strides = array<i32>} : memref<16x128xf32, #tpu.memory_space<vmem>>, vector<16x128xf32>,
    return
  }
  func.func @transform_0(%arg0: i32) -> (i32, i32) {
    %c0_i32 = arith.constant 0 : i32
    %c0_i32_0 = arith.constant 0 : i32
    return %arg0, %c0_i32 : i32, i32
  }
  func.func @transform_1(%arg0: i32) -> (i32, i32) {
    %c0_i32 = arith.constant 0 : i32
    %c0_i32_0 = arith.constant 0 : i32
    %c0_i32_1 = arith.constant 0 : i32
    return %c0_i32, %c0_i32_0 : i32, i32
  }
  func.func @transform_2(%arg0: i32) -> (i32, i32) {
    %c0_i32 = arith.constant 0 : i32
    %c0_i32_0 = arith.constant 0 : i32
    %c0_i32_1 = arith.constant 0 : i32
    return %c0_i32, %c0_i32_0 : i32, i32
  }
  func.func @transform_3(%arg0: i32) -> (i32, i32) {
    %c0_i32 = arith.constant 0 : i32
    %c0_i32_0 = arith.constant 0 : i32
    %c0_i32_1 = arith.constant 0 : i32
    return %c0_i32, %c0_i32_0 : i32, i32
  }
  func.func @transform_4(%arg0: i32) -> (i32, i32) {
    %c0_i32 = arith.constant 0 : i32
    %c0_i32_0 = arith.constant 0 : i32
    %c0_i32_1 = arith.constant 0 : i32
    return %c0_i32, %c0_i32_0 : i32, i32
  }
  func.func @transform_5(%arg0: i32) -> (i32, i32) {
    %c0_i32 = arith.constant 0 : i32
    %c0_i32_0 = arith.constant 0 : i32
    %c0_i32_1 = arith.constant 0 : i32
    return %c0_i32, %c0_i32_0 : i32, i32
  }
  func.func @transform_6(%arg0: i32) -> (i32, i32) {
    %c0_i32 = arith.constant 0 : i32
    %c0_i32_0 = arith.constant 0 : i32
    %c0_i32_1 = arith.constant 0 : i32
    return %c0_i32, %c0_i32_0 : i32, i32
  }
  func.func @transform_7(%arg0: i32) -> (i32, i32) {
    %c0_i32 = arith.constant 0 : i32
    %c0_i32_0 = arith.constant 0 : i32
    return %arg0, %c0_i32 : i32, i32
  }
}

</mosaic_0001>

<bundles_post_ra>
// kernel: neural_network_forward.1
= control target key start
LH: loop header
LB: loop body
LE: loop exit
PB: predicated region body
PF: predicated region fallthrough
CT: control target
= control target key end

     0   :  { %12 = vsyncpa [#allocation3], 0  ;;  %s4233_s0 = inlined_call_operand.vmem [shape: f32[16,784], index: 0, kind: input, shape index: {}]   ;;  %s4234_s1 = inlined_call_operand.hbm [shape: bf16[784,512], index: 1, kind: input, shape index: {}]   ;;  %s4235_s2 = inlined_call_operand.vmem [shape: f32[1,512], index: 2, kind: input, shape index: {}]   ;;  %s4236_s3 = inlined_call_operand.hbm [shape: bf16[512,512], index: 3, kind: input, shape index: {}]   ;;  %s4237_s4 = inlined_call_operand.vmem [shape: f32[1,512], index: 4, kind: input, shape index: {}]   ;;  %s4238_s5 = inlined_call_operand.vmem [shape: bf16[512,128], index: 5, kind: input, shape index: {}]   ;;  %s4239_s6 = inlined_call_operand.vmem [shape: f32[1,128], index: 6, kind: input, shape index: {}]   ;;  %s4240_s7 = inlined_call_operand.vmem [shape: f32[16,128], index: 7, kind: output, shape index: {}]  }
   0x1   :  { %13 = vsyncpa [#allocation5], 0  ;;  %s3983_s24 = smov [#allocation2]   ;;  %s3935_s28 = scalar_lea.hbm %s4234_s1, 25088 }
   0x2   :  { %s21_s25 = sshll.u32 %s3983_s24, 4  ;;  %p3936_p0 = scmp.ne.s32.totalorder %s4234_s1, %s3935_s28  ;;  %s22_s25 = int_to_ptr.vmem [resolvable:$true] %s21_s25 }
   0x3   :  { %p3939_p1 = scmp.lt.u32.totalorder %s3935_s28, %s4234_s1 }
   0x5   :  { %p3941_p2 = pnand %p3939_p1, %p3936_p0 }
   0x7   :  { %3944 = shalt.err (!%p3941_p2)
}
   0x8   :  { %s3945_s10 = scalar_lea.vmem %s22_s25, 25088  ;;  %p3950_p4 = scmp.lt.s32.totalorder %s22_s25, %s22_s25 }
   0x9   :  { %p3946_p3 = scmp.ne.s32.totalorder %s22_s25, %s3945_s10  ;;  %p3951_p5 = scmp.lt.s32.totalorder %s3945_s10, %s3945_s10 }
   0xb   :  { %p3952_p6 = por %p3951_p5, %p3950_p4 }
   0xd   :  { %p3953_p7 = pnand %p3952_p6, %p3946_p3 }
   0xf   :  { %3956 = shalt.err (!%p3953_p7)
}
  0x10   :  { %s3984_s11 = smov 256   ;;  %s3985_s12 = smov 16  }
  0x11   :  { %27 = dma.hbm_to_vmem [thread:$0]  %s4234_s1, 25088, %s22_s25, [#allocation3], %s3984_s11, %s3984_s11, %s3985_s12  }
  0x12   :  { %s3986_s15 = smov [#allocation4]   ;;  %s3957_s19 = scalar_lea.hbm %s4236_s3, 16384 }
  0x13   :  { %s35_s16 = sshll.u32 %s3986_s15, 4  ;;  %p3958_p8 = scmp.ne.s32.totalorder %s4236_s3, %s3957_s19  ;;  %s36_s16 = int_to_ptr.vmem [resolvable:$true] %s35_s16 }
  0x14   :  { %p3961_p9 = scmp.lt.u32.totalorder %s3957_s19, %s4236_s3 }
  0x16   :  { %p3963_p10 = pnand %p3961_p9, %p3958_p8 }
  0x18   :  { %3966 = shalt.err (!%p3963_p10)
}
  0x19   :  { %s3967_s24 = scalar_lea.vmem %s36_s16, 16384  ;;  %p3972_p12 = scmp.lt.s32.totalorder %s36_s16, %s36_s16 }
  0x1a   :  { %p3968_p11 = scmp.ne.s32.totalorder %s36_s16, %s3967_s24  ;;  %p3973_p13 = scmp.lt.s32.totalorder %s3967_s24, %s3967_s24 }
  0x1c   :  { %p3974_p0 = por %p3973_p13, %p3972_p12 }
  0x1e   :  { %p3975_p1 = pnand %p3974_p0, %p3968_p11 }
  0x20   :  { %3978 = shalt.err (!%p3975_p1)
}
  0x21   :  { %41 = dma.hbm_to_vmem [thread:$0]  %s4236_s3, 16384, %s36_s16, [#allocation5], %s3984_s11, %s3984_s11, %s3985_s12  }
  0x22   :  { %3979 = dma.done.wait [#allocation3], 25088  }
  0x23   :  { %3980 = vsyncadd [#allocation3], 4294942208 }
  0x24   :  { %3981 = dma.done.wait [#allocation5], 16384  }
  0x25   :  { %3982 = vsyncadd [#allocation5], 4294950912  ;;  %v3417_v0 = vld [vmem:[#allocation2 + $0x4] ss:$16 sps:$4 sm:$0xff]   ;;  %v3419_v1 = vld [vmem:[#allocation2 + $0xc] ss:$16 sps:$4 sm:$0xff]  }
  0x26   :  { %1278 = vmatprep.subr.bf16.mxu0 %v3417_v0  ;;  %v3421_v2 = vld [vmem:[#allocation2] ss:$16 sps:$4 sm:$0xff]   ;;  %v3422_v3 = vld [vmem:[#allocation2 + $0x8] ss:$16 sps:$4 sm:$0xff]   ;;  %1450 = vmatprep.subr.bf16.mxu1 %v3419_v1  ;;  %v3423_v4 = vld [vmem:[#allocation2 + $0x24] ss:$16 sps:$4 sm:$0xff]  }
  0x27   :  { %1279 = vmatpush1.bf16.msra.mxu0 %v3421_v2  ;;  %1451 = vmatpush1.bf16.msra.mxu1 %v3422_v3  ;;  %v3425_v5 = vld [vmem:[#allocation2 + $0x2c] ss:$16 sps:$4 sm:$0xff]   ;;  %v3427_v6 = vld [vmem:[#allocation2 + $0x20] ss:$16 sps:$4 sm:$0xff]   ;;  %v3428_v7 = vld [vmem:[#allocation2 + $0x28] ss:$16 sps:$4 sm:$0xff]  }
  0x28   :  { %1280 = vmatprep.subr.bf16.mxu0 %v3423_v4  ;;  %1452 = vmatprep.subr.bf16.mxu1 %v3425_v5  ;;  %v3429_v8 = vld [vmem:[#allocation2 + $0x44] ss:$16 sps:$4 sm:$0xff]   ;;  %v3431_v9 = vld [vmem:[#allocation2 + $0x4c] ss:$16 sps:$4 sm:$0xff]   ;;  %v3433_v10 = vld [vmem:[#allocation2 + $0x40] ss:$16 sps:$4 sm:$0xff]  }
  0x29   :  { %v3434_v11 = vld [vmem:[#allocation2 + $0x48] ss:$16 sps:$4 sm:$0xff]   ;;  %v3435_v12 = vld [vmem:[#allocation2 + $0x64] ss:$16 sps:$4 sm:$0xff]   ;;  %v3437_v13 = vld [vmem:[#allocation2 + $0x6c] ss:$16 sps:$4 sm:$0xff]  }
  0x2a   :  { %v3439_v14 = vld [vmem:[#allocation2 + $0x60] ss:$16 sps:$4 sm:$0xff]   ;;  %v3440_v15 = vld [vmem:[#allocation2 + $0x68] ss:$16 sps:$4 sm:$0xff]   ;;  %v3441_v16 = vld [vmem:[#allocation2 + $0x84] ss:$16 sps:$4 sm:$0xff]  }
  0x2b   :  { %1281 = vmatpush1.bf16.msra.mxu0 %v3427_v6  ;;  %1453 = vmatpush1.bf16.msra.mxu1 %v3428_v7  ;;  %v3443_v17 = vld [vmem:[#allocation2 + $0x8c] ss:$16 sps:$4 sm:$0xff]   ;;  %v3445_v18 = vld [vmem:[#allocation2 + $0x80] ss:$16 sps:$4 sm:$0xff]   ;;  %v3446_v19 = vld [vmem:[#allocation2 + $0x88] ss:$16 sps:$4 sm:$0xff]  }
  0x2c   :  { %1282 = vmatprep.subr.bf16.mxu0 %v3429_v8  ;;  %1454 = vmatprep.subr.bf16.mxu1 %v3431_v9  ;;  %v3447_v20 = vld [vmem:[#allocation2 + $0xa4] ss:$16 sps:$4 sm:$0xff]   ;;  %v3449_v21 = vld [vmem:[#allocation2 + $0xac] ss:$16 sps:$4 sm:$0xff]   ;;  %v3451_v22 = vld [vmem:[#allocation2 + $0xa0] ss:$16 sps:$4 sm:$0xff]  }
  0x2d   :  { %v3452_v23 = vld [vmem:[#allocation2 + $0xa8] ss:$16 sps:$4 sm:$0xff]   ;;  %v3453_v24 = vld [vmem:[#allocation2 + $0xc4] ss:$16 sps:$4 sm:$0xff]   ;;  %v3455_v25 = vld [vmem:[#allocation2 + $0xcc] ss:$16 sps:$4 sm:$0xff]  }
  0x2e   :  { %v3457_v26 = vld [vmem:[#allocation2 + $0xc0] ss:$16 sps:$4 sm:$0xff]   ;;  %v3458_v27 = vld [vmem:[#allocation2 + $0xc8] ss:$16 sps:$4 sm:$0xff]   ;;  %v3459_v28 = vld [vmem:[#allocation2 + $0xe4] ss:$16 sps:$4 sm:$0xff]  }
  0x2f   :  { %1283 = vmatpush1.bf16.msra.mxu0 %v3433_v10  ;;  %1455 = vmatpush1.bf16.msra.mxu1 %v3434_v11  ;;  %v3461_v29 = vld [vmem:[#allocation2 + $0xec] ss:$16 sps:$4 sm:$0xff]   ;;  %v3463_v30 = vld [vmem:[#allocation2 + $0xe0] ss:$16 sps:$4 sm:$0xff]   ;;  %v3464_v31 = vld [vmem:[#allocation2 + $0xe8] ss:$16 sps:$4 sm:$0xff]  }
  0x30   :  { %1284 = vmatprep.subr.bf16.mxu0 %v3435_v12  ;;  %1456 = vmatprep.subr.bf16.mxu1 %v3437_v13  ;;  %v3465_v32 = vld [vmem:[#allocation2 + $0x104] ss:$16 sps:$4 sm:$0xff]   ;;  %v3467_v33 = vld [vmem:[#allocation2 + $0x10c] ss:$16 sps:$4 sm:$0xff]   ;;  %v3469_v34 = vld [vmem:[#allocation2 + $0x100] ss:$16 sps:$4 sm:$0xff]  }
  0x31   :  { %v3470_v35 = vld [vmem:[#allocation2 + $0x108] ss:$16 sps:$4 sm:$0xff]   ;;  %v3471_v36 = vld [vmem:[#allocation2 + $0x124] ss:$16 sps:$4 sm:$0xff]   ;;  %v3473_v37 = vld [vmem:[#allocation2 + $0x12c] ss:$16 sps:$4 sm:$0xff]  }
  0x32   :  { %v3475_v38 = vld [vmem:[#allocation2 + $0x120] ss:$16 sps:$4 sm:$0xff]   ;;  %v3476_v39 = vld [vmem:[#allocation2 + $0x128] ss:$16 sps:$4 sm:$0xff]   ;;  %v3477_v40 = vld [vmem:[#allocation2 + $0x144] ss:$16 sps:$4 sm:$0xff]  }
  0x33   :  { %1285 = vmatpush1.bf16.msra.mxu0 %v3439_v14  ;;  %1457 = vmatpush1.bf16.msra.mxu1 %v3440_v15  ;;  %v3479_v41 = vld [vmem:[#allocation2 + $0x14c] ss:$16 sps:$4 sm:$0xff]   ;;  %v3481_v42 = vld [vmem:[#allocation2 + $0x140] ss:$16 sps:$4 sm:$0xff]   ;;  %v3482_v43 = vld [vmem:[#allocation2 + $0x148] ss:$16 sps:$4 sm:$0xff]  }
  0x34   :  { %1286 = vmatprep.subr.bf16.mxu0 %v3441_v16  ;;  %1458 = vmatprep.subr.bf16.mxu1 %v3443_v17  ;;  %v3483_v44 = vld [vmem:[#allocation2 + $0x164] ss:$16 sps:$4 sm:$0xff]   ;;  %v3485_v45 = vld [vmem:[#allocation2 + $0x16c] ss:$16 sps:$4 sm:$0xff]   ;;  %v3487_v48 = vld [vmem:[#allocation2 + $0x160] ss:$16 sps:$4 sm:$0xff]  }
  0x35   :  { %v56_v46 = vld [vmem:[%s4233_s0 + $0x8] sm:$0xff]  ;;  %v63_v47 = vld [vmem:[%s4233_s0 + $0x40] sm:$0xff]  ;;  %v62_v5 = vld [vmem:[%s4233_s0 + $0x38] sm:$0xff]  ;;  %vm1274_vm0 = vcmask 130048  }
  0x36   :  { %v3488_v49 = vld [vmem:[#allocation2 + $0x168] ss:$16 sps:$4 sm:$0xff]   ;;  %v70_v50 = vpack.c.bf16 %v63_v47, %v56_v46  ;;  %v3489_v51 = vld [vmem:[#allocation2 + $0x184] ss:$16 sps:$4 sm:$0xff]   ;;  %v3491_v52 = vld [vmem:[#allocation2 + $0x18c] ss:$16 sps:$4 sm:$0xff]  }
  0x37   :  { %1287 = vmatpush1.bf16.msra.mxu0 %v3445_v18  ;;  %1459 = vmatpush1.bf16.msra.mxu1 %v3446_v19  ;;  %v3493_v53 = vld [vmem:[#allocation2 + $0x180] ss:$16 sps:$4 sm:$0xff]   ;;  %v3494_v54 = vld [vmem:[#allocation2 + $0x188] ss:$16 sps:$4 sm:$0xff]   ;;  %v3495_v55 = vld [vmem:[#allocation2 + $0x1a4] ss:$16 sps:$4 sm:$0xff]  }
  0x38   :  { %1288 = vmatprep.subr.bf16.mxu0 %v3447_v20  ;;  %1460 = vmatprep.subr.bf16.mxu1 %v3449_v21  ;;  %v3497_v56 = vld [vmem:[#allocation2 + $0x1ac] ss:$16 sps:$4 sm:$0xff]   ;;  %v3499_v57 = vld [vmem:[#allocation2 + $0x1a0] ss:$16 sps:$4 sm:$0xff]   ;;  %v3500_v58 = vld [vmem:[#allocation2 + $0x1a8] ss:$16 sps:$4 sm:$0xff]  }
  0x39   :  { %1310 = vmatprep.mubr.bf16.mxu0 %v70_v50  ;;  %1482 = vmatprep.mubr.bf16.mxu1 %v70_v50  ;;  %v3501_v59 = vld [vmem:[#allocation2 + $0x1c4] ss:$16 sps:$4 sm:$0xff]   ;;  %v3503_v60 = vld [vmem:[#allocation2 + $0x1cc] ss:$16 sps:$4 sm:$0xff]   ;;  %v3505_v61 = vld [vmem:[#allocation2 + $0x1c0] ss:$16 sps:$4 sm:$0xff]  }
  0x3a   :  { %v3506_v62 = vld [vmem:[#allocation2 + $0x1c8] ss:$16 sps:$4 sm:$0xff]   ;;  %v3507_v63 = vld [vmem:[#allocation2 + $0x1e4] ss:$16 sps:$4 sm:$0xff]   ;;  %v3509_v0 = vld [vmem:[#allocation2 + $0x1ec] ss:$16 sps:$4 sm:$0xff]  }
  0x3b   :  { %1289 = vmatpush1.bf16.msra.mxu0 %v3451_v22  ;;  %1461 = vmatpush1.bf16.msra.mxu1 %v3452_v23  ;;  %v3511_v1 = vld [vmem:[#allocation2 + $0x1e0] ss:$16 sps:$4 sm:$0xff]   ;;  %v3512_v2 = vld [vmem:[#allocation2 + $0x1e8] ss:$16 sps:$4 sm:$0xff]   ;;  %v3515_v3 = vld [vmem:[#allocation2 + $0x204] ss:$16 sps:$4 sm:$0xff]  }
  0x3c   :  { %1290 = vmatprep.subr.bf16.mxu0 %v3453_v24  ;;  %1462 = vmatprep.subr.bf16.mxu1 %v3455_v25  ;;  %v55_v4 = vld [vmem:[%s4233_s0] sm:$0xff]  ;;  %v3518_v6 = vld [vmem:[#allocation2 + $0x20c] ss:$16 sps:$4 sm:$0xff]   ;;  %v3516_v8 = vld [vmem:[#allocation2 + $0x208] ss:$16 sps:$4 sm:$0xff]  }
  0x3d   :  { %v3513_v7 = vld [vmem:[#allocation2 + $0x200] ss:$16 sps:$4 sm:$0xff]   ;;  %v69_v9 = vpack.c.bf16 %v62_v5, %v55_v4  ;;  %v3521_v10 = vld [vmem:[#allocation2 + $0x224] ss:$16 sps:$4 sm:$0xff]   ;;  %v3524_v11 = vld [vmem:[#allocation2 + $0x22c] ss:$16 sps:$4 sm:$0xff]  }
  0x3e   :  { %v3519_v12 = vld [vmem:[#allocation2 + $0x220] ss:$16 sps:$4 sm:$0xff]   ;;  %v3522_v13 = vld [vmem:[#allocation2 + $0x228] ss:$16 sps:$4 sm:$0xff]   ;;  %v3527_v14 = vld [vmem:[#allocation2 + $0x244] ss:$16 sps:$4 sm:$0xff]  }
  0x3f   :  { %1291 = vmatpush1.bf16.msra.mxu0 %v3457_v26  ;;  %1463 = vmatpush1.bf16.msra.mxu1 %v3458_v27  ;;  %v3530_v15 = vld [vmem:[#allocation2 + $0x24c] ss:$16 sps:$4 sm:$0xff]   ;;  %v3525_v16 = vld [vmem:[#allocation2 + $0x240] ss:$16 sps:$4 sm:$0xff]   ;;  %v3528_v17 = vld [vmem:[#allocation2 + $0x248] ss:$16 sps:$4 sm:$0xff]  }
  0x40   :  { %1292 = vmatprep.subr.bf16.mxu0 %v3459_v28  ;;  %1464 = vmatprep.subr.bf16.mxu1 %v3461_v29  ;;  %v3533_v18 = vld [vmem:[#allocation2 + $0x264] ss:$16 sps:$4 sm:$0xff]   ;;  %v3536_v19 = vld [vmem:[#allocation2 + $0x26c] ss:$16 sps:$4 sm:$0xff]   ;;  %v3531_v20 = vld [vmem:[#allocation2 + $0x260] ss:$16 sps:$4 sm:$0xff]  }
  0x41   :  { %v3534_v21 = vld [vmem:[#allocation2 + $0x268] ss:$16 sps:$4 sm:$0xff]   ;;  %v3539_v22 = vld [vmem:[#allocation2 + $0x284] ss:$16 sps:$4 sm:$0xff]   ;;  %v3542_v23 = vld [vmem:[#allocation2 + $0x28c] ss:$16 sps:$4 sm:$0xff]  }
  0x42   :  { %v3537_v24 = vld [vmem:[#allocation2 + $0x280] ss:$16 sps:$4 sm:$0xff]   ;;  %v3540_v25 = vld [vmem:[#allocation2 + $0x288] ss:$16 sps:$4 sm:$0xff]   ;;  %v3545_v26 = vld [vmem:[#allocation2 + $0x2a4] ss:$16 sps:$4 sm:$0xff]  }
  0x43   :  { %1293 = vmatpush1.bf16.msra.mxu0 %v3463_v30  ;;  %1465 = vmatpush1.bf16.msra.mxu1 %v3464_v31  ;;  %v3548_v27 = vld [vmem:[#allocation2 + $0x2ac] ss:$16 sps:$4 sm:$0xff]   ;;  %v3543_v28 = vld [vmem:[#allocation2 + $0x2a0] ss:$16 sps:$4 sm:$0xff]   ;;  %v3546_v29 = vld [vmem:[#allocation2 + $0x2a8] ss:$16 sps:$4 sm:$0xff]  }
  0x44   :  { %1294 = vmatprep.subr.bf16.mxu0 %v3465_v32  ;;  %1466 = vmatprep.subr.bf16.mxu1 %v3467_v33  ;;  %v3551_v30 = vld [vmem:[#allocation2 + $0x2c4] ss:$16 sps:$4 sm:$0xff]   ;;  %v3554_v31 = vld [vmem:[#allocation2 + $0x2cc] ss:$16 sps:$4 sm:$0xff]   ;;  %v3567_v47 = vld [vmem:[#allocation2 + $0x320] ss:$16 sps:$4 sm:$0xff]  }
  0x45   :  { %v58_v32 = vld [vmem:[%s4233_s0 + $0x18] sm:$0xff]  ;;  %v65_v33 = vld [vmem:[%s4233_s0 + $0x50] sm:$0xff] }
  0x46   :  { %v3572_v46 = vld [vmem:[#allocation2 + $0x32c] ss:$16 sps:$4 sm:$0xff]   ;;  %v3600_v4 = vld [vmem:[#allocation2 + $0x3c8] ss:$16 sps:$4 sm:$0xff]   ;;  %v3605_v5 = vld [vmem:[#allocation2 + $0x3e4] ss:$16 sps:$4 sm:$0xff]  }
  0x47   :  { %1295 = vmatpush1.bf16.msra.mxu0 %v3469_v34  ;;  %1467 = vmatpush1.bf16.msra.mxu1 %v3470_v35  ;;  %v3549_v34 = vld [vmem:[#allocation2 + $0x2c0] ss:$16 sps:$4 sm:$0xff]   ;;  %v3552_v35 = vld [vmem:[#allocation2 + $0x2c8] ss:$16 sps:$4 sm:$0xff]   ;;  %v3578_v50 = vld [vmem:[#allocation2 + $0x34c] ss:$16 sps:$4 sm:$0xff]  }
  0x48   :  { %1296 = vmatprep.subr.bf16.mxu0 %v3471_v36  ;;  %1468 = vmatprep.subr.bf16.mxu1 %v3473_v37  ;;  %v72_v36 = vpack.c.bf16 %v65_v33, %v58_v32  ;;  %v3557_v37 = vld [vmem:[#allocation2 + $0x2e4] ss:$16 sps:$4 sm:$0xff]   ;;  %v3638_v32 = vld [vmem:[#allocation2 + $0x48c] ss:$16 sps:$4 sm:$0xff]   ;;  %v3633_v33 = vld [vmem:[#allocation2 + $0x480] ss:$16 sps:$4 sm:$0xff]  }
  0x4b   :  { %1297 = vmatpush1.bf16.msra.mxu0 %v3475_v38  ;;  %1469 = vmatpush1.bf16.msra.mxu1 %v3476_v39  ;;  %v3560_v38 = vld [vmem:[#allocation2 + $0x2ec] ss:$16 sps:$4 sm:$0xff]   ;;  %v3555_v39 = vld [vmem:[#allocation2 + $0x2e0] ss:$16 sps:$4 sm:$0xff]  }
  0x4c   :  { %1298 = vmatprep.subr.bf16.mxu0 %v3477_v40  ;;  %1470 = vmatprep.subr.bf16.mxu1 %v3479_v41  ;;  %v3558_v40 = vld [vmem:[#allocation2 + $0x2e8] ss:$16 sps:$4 sm:$0xff]   ;;  %v3563_v41 = vld [vmem:[#allocation2 + $0x304] ss:$16 sps:$4 sm:$0xff]  }
  0x4f   :  { %1299 = vmatpush1.bf16.msra.mxu0 %v3481_v42  ;;  %1471 = vmatpush1.bf16.msra.mxu1 %v3482_v43  ;;  %v3566_v42 = vld [vmem:[#allocation2 + $0x30c] ss:$16 sps:$4 sm:$0xff]   ;;  %v3561_v43 = vld [vmem:[#allocation2 + $0x300] ss:$16 sps:$4 sm:$0xff]  }
  0x50   :  { %1300 = vmatprep.subr.bf16.mxu0 %v3483_v44  ;;  %1472 = vmatprep.subr.bf16.mxu1 %v3485_v45  ;;  %v3564_v44 = vld [vmem:[#allocation2 + $0x308] ss:$16 sps:$4 sm:$0xff]   ;;  %v3569_v45 = vld [vmem:[#allocation2 + $0x324] ss:$16 sps:$4 sm:$0xff]  }
  0x53   :  { %1301 = vmatpush1.bf16.msra.mxu0 %v3487_v48  ;;  %1473 = vmatpush1.bf16.msra.mxu1 %v3488_v49  ;;  %v3570_v48 = vld [vmem:[#allocation2 + $0x328] ss:$16 sps:$4 sm:$0xff]   ;;  %v3575_v49 = vld [vmem:[#allocation2 + $0x344] ss:$16 sps:$4 sm:$0xff]  }
  0x54   :  { %1302 = vmatprep.subr.bf16.mxu0 %v3489_v51  ;;  %1474 = vmatprep.subr.bf16.mxu1 %v3491_v52  ;;  %v3573_v51 = vld [vmem:[#allocation2 + $0x340] ss:$16 sps:$4 sm:$0xff]   ;;  %v3576_v52 = vld [vmem:[#allocation2 + $0x348] ss:$16 sps:$4 sm:$0xff]  }
  0x57   :  { %1303 = vmatpush1.bf16.msra.mxu0 %v3493_v53  ;;  %1475 = vmatpush1.bf16.msra.mxu1 %v3494_v54  ;;  %v3581_v53 = vld [vmem:[#allocation2 + $0x364] ss:$16 sps:$4 sm:$0xff]   ;;  %v3584_v54 = vld [vmem:[#allocation2 + $0x36c] ss:$16 sps:$4 sm:$0xff]  }
  0x58   :  { %1304 = vmatprep.subr.bf16.mxu0 %v3495_v55  ;;  %1476 = vmatprep.subr.bf16.mxu1 %v3497_v56  ;;  %v3579_v55 = vld [vmem:[#allocation2 + $0x360] ss:$16 sps:$4 sm:$0xff]   ;;  %v3582_v56 = vld [vmem:[#allocation2 + $0x368] ss:$16 sps:$4 sm:$0xff]  }
  0x5b   :  { %1305 = vmatpush1.bf16.msra.mxu0 %v3499_v57  ;;  %1477 = vmatpush1.bf16.msra.mxu1 %v3500_v58  ;;  %v3587_v57 = vld [vmem:[#allocation2 + $0x384] ss:$16 sps:$4 sm:$0xff]   ;;  %v3590_v58 = vld [vmem:[#allocation2 + $0x38c] ss:$16 sps:$4 sm:$0xff]  }
  0x5c   :  { %1306 = vmatprep.subr.bf16.mxu0 %v3501_v59  ;;  %1478 = vmatprep.subr.bf16.mxu1 %v3503_v60  ;;  %v3585_v59 = vld [vmem:[#allocation2 + $0x380] ss:$16 sps:$4 sm:$0xff]   ;;  %v3588_v60 = vld [vmem:[#allocation2 + $0x388] ss:$16 sps:$4 sm:$0xff]  }
  0x5f   :  { %1307 = vmatpush1.bf16.msra.mxu0 %v3505_v61  ;;  %1479 = vmatpush1.bf16.msra.mxu1 %v3506_v62  ;;  %v3593_v61 = vld [vmem:[#allocation2 + $0x3a4] ss:$16 sps:$4 sm:$0xff]   ;;  %v3596_v62 = vld [vmem:[#allocation2 + $0x3ac] ss:$16 sps:$4 sm:$0xff]  }
  0x60   :  { %1308 = vmatprep.subr.bf16.mxu0 %v3507_v63  ;;  %1480 = vmatprep.subr.bf16.mxu1 %v3509_v0  ;;  %v3591_v63 = vld [vmem:[#allocation2 + $0x3a0] ss:$16 sps:$4 sm:$0xff]   ;;  %v3594_v0 = vld [vmem:[#allocation2 + $0x3a8] ss:$16 sps:$4 sm:$0xff]  }
  0x63   :  { %1309 = vmatpush1.bf16.msra.mxu0 %v3511_v1  ;;  %1481 = vmatpush1.bf16.msra.mxu1 %v3512_v2  ;;  %v3599_v1 = vld [vmem:[#allocation2 + $0x3c4] ss:$16 sps:$4 sm:$0xff]   ;;  %v3602_v2 = vld [vmem:[#allocation2 + $0x3cc] ss:$16 sps:$4 sm:$0xff]  }
  0x64   :  { %1321 = vmatprep.subr.bf16.mxu0 %v3515_v3  ;;  %1493 = vmatprep.subr.bf16.mxu1 %v3518_v6  ;;  %v3597_v3 = vld [vmem:[#allocation2 + $0x3c0] ss:$16 sps:$4 sm:$0xff]   ;;  %v3608_v6 = vld [vmem:[#allocation2 + $0x3ec] ss:$16 sps:$4 sm:$0xff]  }
  0x66   :  { %1311 = vmatmul.mubr.bf16.vlgmr.msra.gmra.mrb[0].mxu0 %v69_v9  ;;  %1483 = vmatmul.mubr.bf16.vlgmr.msra.gmra.mrb[0].mxu1 %v69_v9  ;;  %v3611_v9 = vld [vmem:[#allocation2 + $0x404] ss:$16 sps:$4 sm:$0xff]  }
  0x67   :  { %1322 = vmatpush1.bf16.msra.mxu0 %v3513_v7  ;;  %1494 = vmatpush1.bf16.msra.mxu1 %v3516_v8  ;;  %v3603_v7 = vld [vmem:[#allocation2 + $0x3e0] ss:$16 sps:$4 sm:$0xff]   ;;  %v3606_v8 = vld [vmem:[#allocation2 + $0x3e8] ss:$16 sps:$4 sm:$0xff]  }
  0x68   :  { %1323 = vmatprep.subr.bf16.mxu0 %v3521_v10  ;;  %1495 = vmatprep.subr.bf16.mxu1 %v3524_v11  ;;  %v57_v10 = vld [vmem:[%s4233_s0 + $0x10] sm:$0xff]  ;;  %v64_v11 = vld [vmem:[%s4233_s0 + $0x48] sm:$0xff] }
  0x69   :  { %1353 = vmatprep.mubr.bf16.mxu0 %v72_v36  ;;  %1525 = vmatprep.mubr.bf16.mxu1 %v72_v36  ;;  %v3644_v36 = vld [vmem:[#allocation2 + $0x4ac] ss:$16 sps:$4 sm:$0xff]  }
  0x6b   :  { %1324 = vmatpush1.bf16.msra.mxu0 %v3519_v12  ;;  %1496 = vmatpush1.bf16.msra.mxu1 %v3522_v13  ;;  %v3614_v12 = vld [vmem:[#allocation2 + $0x40c] ss:$16 sps:$4 sm:$0xff]   ;;  %v3609_v13 = vld [vmem:[#allocation2 + $0x400] ss:$16 sps:$4 sm:$0xff]  }
  0x6c   :  { %1325 = vmatprep.subr.bf16.mxu0 %v3527_v14  ;;  %1497 = vmatprep.subr.bf16.mxu1 %v3530_v15  ;;  %v3612_v14 = vld [vmem:[#allocation2 + $0x408] ss:$16 sps:$4 sm:$0xff]   ;;  %v71_v15 = vpack.c.bf16 %v64_v11, %v57_v10  ;;  %v3701_v11 = vld [vmem:[#allocation2 + $0x5e4] ss:$16 sps:$4 sm:$0xff]  }
  0x6d   :  { %v3696_v10 = vld [vmem:[#allocation2 + $0x5c8] ss:$16 sps:$4 sm:$0xff]  }
  0x6f   :  { %1326 = vmatpush1.bf16.msra.mxu0 %v3525_v16  ;;  %1498 = vmatpush1.bf16.msra.mxu1 %v3528_v17  ;;  %v3617_v16 = vld [vmem:[#allocation2 + $0x424] ss:$16 sps:$4 sm:$0xff]   ;;  %v3620_v17 = vld [vmem:[#allocation2 + $0x42c] ss:$16 sps:$4 sm:$0xff]  }
  0x70   :  { %1327 = vmatprep.subr.bf16.mxu0 %v3533_v18  ;;  %1499 = vmatprep.subr.bf16.mxu1 %v3536_v19  ;;  %v60_v18 = vld [vmem:[%s4233_s0 + $0x28] sm:$0xff]  ;;  %v3615_v19 = vld [vmem:[#allocation2 + $0x420] ss:$16 sps:$4 sm:$0xff]  }
  0x73   :  { %1328 = vmatpush1.bf16.msra.mxu0 %v3531_v20  ;;  %1500 = vmatpush1.bf16.msra.mxu1 %v3534_v21  ;;  %v3618_v20 = vld [vmem:[#allocation2 + $0x428] ss:$16 sps:$4 sm:$0xff]   ;;  %v67_v21 = vld [vmem:[%s4233_s0 + $0x60] sm:$0xff] }
  0x74   :  { %1329 = vmatprep.subr.bf16.mxu0 %v3539_v22  ;;  %1501 = vmatprep.subr.bf16.mxu1 %v3542_v23  ;;  %v3623_v22 = vld [vmem:[#allocation2 + $0x444] ss:$16 sps:$4 sm:$0xff]   ;;  %v74_v23 = vpack.c.bf16 %v67_v21, %v60_v18  ;;  %v3710_v18 = vld [vmem:[#allocation2 + $0x60c] ss:$16 sps:$4 sm:$0xff]  }
  0x77   :  { %1330 = vmatpush1.bf16.msra.mxu0 %v3537_v24  ;;  %1502 = vmatpush1.bf16.msra.mxu1 %v3540_v25  ;;  %v3626_v24 = vld [vmem:[#allocation2 + $0x44c] ss:$16 sps:$4 sm:$0xff]   ;;  %v3621_v25 = vld [vmem:[#allocation2 + $0x440] ss:$16 sps:$4 sm:$0xff]  }
  0x78   :  { %1331 = vmatprep.subr.bf16.mxu0 %v3545_v26  ;;  %1503 = vmatprep.subr.bf16.mxu1 %v3548_v27  ;;  %v3624_v26 = vld [vmem:[#allocation2 + $0x448] ss:$16 sps:$4 sm:$0xff]   ;;  %v3629_v27 = vld [vmem:[#allocation2 + $0x464] ss:$16 sps:$4 sm:$0xff]  }
  0x7b   :  { %1332 = vmatpush1.bf16.msra.mxu0 %v3543_v28  ;;  %1504 = vmatpush1.bf16.msra.mxu1 %v3546_v29  ;;  %v3632_v28 = vld [vmem:[#allocation2 + $0x46c] ss:$16 sps:$4 sm:$0xff]   ;;  %v3627_v29 = vld [vmem:[#allocation2 + $0x460] ss:$16 sps:$4 sm:$0xff]  }
  0x7c   :  { %1333 = vmatprep.subr.bf16.mxu0 %v3551_v30  ;;  %1505 = vmatprep.subr.bf16.mxu1 %v3554_v31  ;;  %v3630_v30 = vld [vmem:[#allocation2 + $0x468] ss:$16 sps:$4 sm:$0xff]   ;;  %v3635_v31 = vld [vmem:[#allocation2 + $0x484] ss:$16 sps:$4 sm:$0xff]  }
  0x7f   :  { %1334 = vmatpush1.bf16.msra.mxu0 %v3549_v34  ;;  %1506 = vmatpush1.bf16.msra.mxu1 %v3552_v35  ;;  %v3636_v34 = vld [vmem:[#allocation2 + $0x488] ss:$16 sps:$4 sm:$0xff]   ;;  %v3641_v35 = vld [vmem:[#allocation2 + $0x4a4] ss:$16 sps:$4 sm:$0xff]  }
  0x80   :  { %1335 = vmatprep.subr.bf16.mxu0 %v3557_v37  ;;  %1507 = vmatprep.subr.bf16.mxu1 %v3560_v38  ;;  %v3639_v37 = vld [vmem:[#allocation2 + $0x4a0] ss:$16 sps:$4 sm:$0xff]   ;;  %v3642_v38 = vld [vmem:[#allocation2 + $0x4a8] ss:$16 sps:$4 sm:$0xff]  }
  0x83   :  { %1336 = vmatpush1.bf16.msra.mxu0 %v3555_v39  ;;  %1508 = vmatpush1.bf16.msra.mxu1 %v3558_v40  ;;  %v3647_v39 = vld [vmem:[#allocation2 + $0x4c4] ss:$16 sps:$4 sm:$0xff]   ;;  %v3650_v40 = vld [vmem:[#allocation2 + $0x4cc] ss:$16 sps:$4 sm:$0xff]  }
  0x84   :  { %1337 = vmatprep.subr.bf16.mxu0 %v3563_v41  ;;  %1509 = vmatprep.subr.bf16.mxu1 %v3566_v42  ;;  %v3645_v41 = vld [vmem:[#allocation2 + $0x4c0] ss:$16 sps:$4 sm:$0xff]   ;;  %v3648_v42 = vld [vmem:[#allocation2 + $0x4c8] ss:$16 sps:$4 sm:$0xff]  }
  0x87   :  { %1338 = vmatpush1.bf16.msra.mxu0 %v3561_v43  ;;  %1510 = vmatpush1.bf16.msra.mxu1 %v3564_v44  ;;  %v3653_v43 = vld [vmem:[#allocation2 + $0x4e4] ss:$16 sps:$4 sm:$0xff]   ;;  %v3656_v44 = vld [vmem:[#allocation2 + $0x4ec] ss:$16 sps:$4 sm:$0xff]  }
  0x88   :  { %1339 = vmatprep.subr.bf16.mxu0 %v3569_v45  ;;  %1511 = vmatprep.subr.bf16.mxu1 %v3572_v46  ;;  %v3651_v45 = vld [vmem:[#allocation2 + $0x4e0] ss:$16 sps:$4 sm:$0xff]   ;;  %v3654_v46 = vld [vmem:[#allocation2 + $0x4e8] ss:$16 sps:$4 sm:$0xff]  }
  0x8b   :  { %1340 = vmatpush1.bf16.msra.mxu0 %v3567_v47  ;;  %1512 = vmatpush1.bf16.msra.mxu1 %v3570_v48  ;;  %v3659_v47 = vld [vmem:[#allocation2 + $0x504] ss:$16 sps:$4 sm:$0xff]   ;;  %v3662_v48 = vld [vmem:[#allocation2 + $0x50c] ss:$16 sps:$4 sm:$0xff]  }
  0x8c   :  { %1341 = vmatprep.subr.bf16.mxu0 %v3575_v49  ;;  %1513 = vmatprep.subr.bf16.mxu1 %v3578_v50  ;;  %v3657_v49 = vld [vmem:[#allocation2 + $0x500] ss:$16 sps:$4 sm:$0xff]   ;;  %v3660_v50 = vld [vmem:[#allocation2 + $0x508] ss:$16 sps:$4 sm:$0xff]  }
  0x8f   :  { %1342 = vmatpush1.bf16.msra.mxu0 %v3573_v51  ;;  %1514 = vmatpush1.bf16.msra.mxu1 %v3576_v52  ;;  %v3665_v51 = vld [vmem:[#allocation2 + $0x524] ss:$16 sps:$4 sm:$0xff]   ;;  %v3668_v52 = vld [vmem:[#allocation2 + $0x52c] ss:$16 sps:$4 sm:$0xff]  }
  0x90   :  { %1343 = vmatprep.subr.bf16.mxu0 %v3581_v53  ;;  %1515 = vmatprep.subr.bf16.mxu1 %v3584_v54  ;;  %v3663_v53 = vld [vmem:[#allocation2 + $0x520] ss:$16 sps:$4 sm:$0xff]   ;;  %v3666_v54 = vld [vmem:[#allocation2 + $0x528] ss:$16 sps:$4 sm:$0xff]  }
  0x93   :  { %1344 = vmatpush1.bf16.msra.mxu0 %v3579_v55  ;;  %1516 = vmatpush1.bf16.msra.mxu1 %v3582_v56  ;;  %v3671_v55 = vld [vmem:[#allocation2 + $0x544] ss:$16 sps:$4 sm:$0xff]   ;;  %v3674_v56 = vld [vmem:[#allocation2 + $0x54c] ss:$16 sps:$4 sm:$0xff]  }
  0x94   :  { %1345 = vmatprep.subr.bf16.mxu0 %v3587_v57  ;;  %1517 = vmatprep.subr.bf16.mxu1 %v3590_v58  ;;  %v3669_v57 = vld [vmem:[#allocation2 + $0x540] ss:$16 sps:$4 sm:$0xff]   ;;  %v3672_v58 = vld [vmem:[#allocation2 + $0x548] ss:$16 sps:$4 sm:$0xff]  }
  0x97   :  { %1346 = vmatpush1.bf16.msra.mxu0 %v3585_v59  ;;  %1518 = vmatpush1.bf16.msra.mxu1 %v3588_v60  ;;  %v3677_v59 = vld [vmem:[#allocation2 + $0x564] ss:$16 sps:$4 sm:$0xff]   ;;  %v3680_v60 = vld [vmem:[#allocation2 + $0x56c] ss:$16 sps:$4 sm:$0xff]  }
  0x98   :  { %1347 = vmatprep.subr.bf16.mxu0 %v3593_v61  ;;  %1519 = vmatprep.subr.bf16.mxu1 %v3596_v62  ;;  %v3675_v61 = vld [vmem:[#allocation2 + $0x560] ss:$16 sps:$4 sm:$0xff]   ;;  %v3678_v62 = vld [vmem:[#allocation2 + $0x568] ss:$16 sps:$4 sm:$0xff]  }
  0x9b   :  { %1348 = vmatpush1.bf16.msra.mxu0 %v3591_v63  ;;  %1520 = vmatpush1.bf16.msra.mxu1 %v3594_v0  ;;  %v3683_v63 = vld [vmem:[#allocation2 + $0x584] ss:$16 sps:$4 sm:$0xff]   ;;  %v3686_v0 = vld [vmem:[#allocation2 + $0x58c] ss:$16 sps:$4 sm:$0xff]  }
  0x9c   :  { %1349 = vmatprep.subr.bf16.mxu0 %v3599_v1  ;;  %1521 = vmatprep.subr.bf16.mxu1 %v3602_v2  ;;  %v3681_v1 = vld [vmem:[#allocation2 + $0x580] ss:$16 sps:$4 sm:$0xff]   ;;  %v3684_v2 = vld [vmem:[#allocation2 + $0x588] ss:$16 sps:$4 sm:$0xff]  }
  0x9f   :  { %1350 = vmatpush1.bf16.msra.mxu0 %v3597_v3  ;;  %1522 = vmatpush1.bf16.msra.mxu1 %v3600_v4  ;;  %v3689_v3 = vld [vmem:[#allocation2 + $0x5a4] ss:$16 sps:$4 sm:$0xff]   ;;  %v3692_v4 = vld [vmem:[#allocation2 + $0x5ac] ss:$16 sps:$4 sm:$0xff]  }
  0xa0   :  { %1351 = vmatprep.subr.bf16.mxu0 %v3605_v5  ;;  %1523 = vmatprep.subr.bf16.mxu1 %v3608_v6  ;;  %v3687_v5 = vld [vmem:[#allocation2 + $0x5a0] ss:$16 sps:$4 sm:$0xff]   ;;  %v3690_v6 = vld [vmem:[#allocation2 + $0x5a8] ss:$16 sps:$4 sm:$0xff]  }
  0xa3   :  { %1352 = vmatpush1.bf16.msra.mxu0 %v3603_v7  ;;  %1524 = vmatpush1.bf16.msra.mxu1 %v3606_v8  ;;  %v3695_v7 = vld [vmem:[#allocation2 + $0x5c4] ss:$16 sps:$4 sm:$0xff]   ;;  %v3698_v8 = vld [vmem:[#allocation2 + $0x5cc] ss:$16 sps:$4 sm:$0xff]  }
  0xa4   :  { %1364 = vmatprep.subr.bf16.mxu0 %v3611_v9  ;;  %1536 = vmatprep.subr.bf16.mxu1 %v3614_v12  ;;  %v3693_v9 = vld [vmem:[#allocation2 + $0x5c0] ss:$16 sps:$4 sm:$0xff]   ;;  %v3704_v12 = vld [vmem:[#allocation2 + $0x5ec] ss:$16 sps:$4 sm:$0xff]  }
  0xa6   :  { %1354 = vmatmul.mubr.bf16.vlgmr.msra.gmra.mrb[0].mxu0 %v71_v15  ;;  %1526 = vmatmul.mubr.bf16.vlgmr.msra.gmra.mrb[0].mxu1 %v71_v15  ;;  %v59_v15 = vld [vmem:[%s4233_s0 + $0x20] sm:$0xff] }
  0xa7   :  { %1365 = vmatpush1.bf16.msra.mxu0 %v3609_v13  ;;  %1537 = vmatpush1.bf16.msra.mxu1 %v3612_v14  ;;  %v3699_v13 = vld [vmem:[#allocation2 + $0x5e0] ss:$16 sps:$4 sm:$0xff]   ;;  %v3702_v14 = vld [vmem:[#allocation2 + $0x5e8] ss:$16 sps:$4 sm:$0xff]  }
  0xa8   :  { %1366 = vmatprep.subr.bf16.mxu0 %v3617_v16  ;;  %1538 = vmatprep.subr.bf16.mxu1 %v3620_v17  ;;  %v66_v16 = vld [vmem:[%s4233_s0 + $0x58] sm:$0xff]  ;;  %v3707_v17 = vld [vmem:[#allocation2 + $0x604] ss:$16 sps:$4 sm:$0xff]  }
  0xa9   :  { %1396 = vmatprep.mubr.bf16.mxu0 %v74_v23  ;;  %1568 = vmatprep.mubr.bf16.mxu1 %v74_v23  ;;  %v73_v21 = vpack.c.bf16 %v66_v16, %v59_v15  ;;  %v3716_v23 = vld [vmem:[#allocation4 + $0xc] ss:$16 sps:$4 sm:$0xff]   ;;  %v3789_v16 = vld [vmem:[#allocation4 + $0x1a0] ss:$16 sps:$4 sm:$0xff]  }
  0xaa   :  { %v3794_v15 = vld [vmem:[#allocation4 + $0x1ac] ss:$16 sps:$4 sm:$0xff]  }
  0xab   :  { %1367 = vmatpush1.bf16.msra.mxu0 %v3615_v19  ;;  %1539 = vmatpush1.bf16.msra.mxu1 %v3618_v20  ;;  %v3705_v19 = vld [vmem:[#allocation2 + $0x600] ss:$16 sps:$4 sm:$0xff]   ;;  %v3708_v20 = vld [vmem:[#allocation2 + $0x608] ss:$16 sps:$4 sm:$0xff]  }
  0xac   :  { %1368 = vmatprep.subr.bf16.mxu0 %v3623_v22  ;;  %1540 = vmatprep.subr.bf16.mxu1 %v3626_v24  ;;  %v3713_v22 = vld [vmem:[#allocation4 + $0x4] ss:$16 sps:$4 sm:$0xff]   ;;  %v3987_v24 = vmov 0  }
  0xaf   :  { %1369 = vmatpush1.bf16.msra.mxu0 %v3621_v25  ;;  %1541 = vmatpush1.bf16.msra.mxu1 %v3624_v26  ;;  %v61_v25 = vld [vmem:[%s4233_s0 + $0x30] sm:$0xff]  ;;  %v68_v26 = vld [vmem:[%s4233_s0 + $0x68] sm:$0xff] }
  0xb0   :  { %1370 = vmatprep.subr.bf16.mxu0 %v3629_v27  ;;  %1542 = vmatprep.subr.bf16.mxu1 %v3632_v28  ;;  %v3711_v27 = vld [vmem:[#allocation4] ss:$16 sps:$4 sm:$0xff]   ;;  %v3714_v28 = vld [vmem:[#allocation4 + $0x8] ss:$16 sps:$4 sm:$0xff]  }
  0xb3   :  { %1371 = vmatpush1.bf16.msra.mxu0 %v3627_v29  ;;  %1543 = vmatpush1.bf16.msra.mxu1 %v3630_v30  ;;  %v75_v29 = vpack.c.bf16 %v68_v26, %v61_v25  ;;  %v3719_v30 = vld [vmem:[#allocation4 + $0x24] ss:$16 sps:$4 sm:$0xff]   ;;  %v3804_v25 = vld [vmem:[#allocation4 + $0x1e8] ss:$16 sps:$4 sm:$0xff]  }
  0xb4   :  { %1372 = vmatprep.subr.bf16.mxu0 %v3635_v31  ;;  %1544 = vmatprep.subr.bf16.mxu1 %v3638_v32  ;;  %v3722_v31 = vld [vmem:[#allocation4 + $0x2c] ss:$16 sps:$4 sm:$0xff]   ;;  %v3717_v32 = vld [vmem:[#allocation4 + $0x20] ss:$16 sps:$4 sm:$0xff]   ;;  %v3809_v26 = vld [vmem:[#allocation4 + $0x204] ss:$16 sps:$4 sm:$0xff]  }
  0xb7   :  { %1373 = vmatpush1.bf16.msra.mxu0 %v3633_v33  ;;  %1545 = vmatpush1.bf16.msra.mxu1 %v3636_v34  ;;  %v3720_v33 = vld [vmem:[#allocation4 + $0x28] ss:$16 sps:$4 sm:$0xff]   ;;  %v3725_v34 = vld [vmem:[#allocation4 + $0x44] ss:$16 sps:$4 sm:$0xff]  }
  0xb8   :  { %1374 = vmatprep.subr.bf16.mxu0 %v3641_v35  ;;  %1546 = vmatprep.subr.bf16.mxu1 %v3644_v36  ;;  %v3728_v35 = vld [vmem:[#allocation4 + $0x4c] ss:$16 sps:$4 sm:$0xff]   ;;  %v3723_v36 = vld [vmem:[#allocation4 + $0x40] ss:$16 sps:$4 sm:$0xff]  }
  0xbb   :  { %1375 = vmatpush1.bf16.msra.mxu0 %v3639_v37  ;;  %1547 = vmatpush1.bf16.msra.mxu1 %v3642_v38  ;;  %v3726_v37 = vld [vmem:[#allocation4 + $0x48] ss:$16 sps:$4 sm:$0xff]   ;;  %v3731_v38 = vld [vmem:[#allocation4 + $0x64] ss:$16 sps:$4 sm:$0xff]  }
  0xbc   :  { %1376 = vmatprep.subr.bf16.mxu0 %v3647_v39  ;;  %1548 = vmatprep.subr.bf16.mxu1 %v3650_v40  ;;  %v3734_v39 = vld [vmem:[#allocation4 + $0x6c] ss:$16 sps:$4 sm:$0xff]   ;;  %v3729_v40 = vld [vmem:[#allocation4 + $0x60] ss:$16 sps:$4 sm:$0xff]  }
  0xbf   :  { %1377 = vmatpush1.bf16.msra.mxu0 %v3645_v41  ;;  %1549 = vmatpush1.bf16.msra.mxu1 %v3648_v42  ;;  %v3732_v41 = vld [vmem:[#allocation4 + $0x68] ss:$16 sps:$4 sm:$0xff]   ;;  %v3737_v42 = vld [vmem:[#allocation4 + $0x84] ss:$16 sps:$4 sm:$0xff]  }
  0xc0   :  { %1378 = vmatprep.subr.bf16.mxu0 %v3653_v43  ;;  %1550 = vmatprep.subr.bf16.mxu1 %v3656_v44  ;;  %v3740_v43 = vld [vmem:[#allocation4 + $0x8c] ss:$16 sps:$4 sm:$0xff]   ;;  %v3735_v44 = vld [vmem:[#allocation4 + $0x80] ss:$16 sps:$4 sm:$0xff]  }
  0xc3   :  { %1379 = vmatpush1.bf16.msra.mxu0 %v3651_v45  ;;  %1551 = vmatpush1.bf16.msra.mxu1 %v3654_v46  ;;  %v3738_v45 = vld [vmem:[#allocation4 + $0x88] ss:$16 sps:$4 sm:$0xff]   ;;  %v3743_v46 = vld [vmem:[#allocation4 + $0xa4] ss:$16 sps:$4 sm:$0xff]  }
  0xc4   :  { %1380 = vmatprep.subr.bf16.mxu0 %v3659_v47  ;;  %1552 = vmatprep.subr.bf16.mxu1 %v3662_v48  ;;  %v3746_v47 = vld [vmem:[#allocation4 + $0xac] ss:$16 sps:$4 sm:$0xff]   ;;  %v3741_v48 = vld [vmem:[#allocation4 + $0xa0] ss:$16 sps:$4 sm:$0xff]  }
  0xc7   :  { %1381 = vmatpush1.bf16.msra.mxu0 %v3657_v49  ;;  %1553 = vmatpush1.bf16.msra.mxu1 %v3660_v50  ;;  %v3744_v49 = vld [vmem:[#allocation4 + $0xa8] ss:$16 sps:$4 sm:$0xff]   ;;  %v3749_v50 = vld [vmem:[#allocation4 + $0xc4] ss:$16 sps:$4 sm:$0xff]  }
  0xc8   :  { %1382 = vmatprep.subr.bf16.mxu0 %v3665_v51  ;;  %1554 = vmatprep.subr.bf16.mxu1 %v3668_v52  ;;  %v3752_v51 = vld [vmem:[#allocation4 + $0xcc] ss:$16 sps:$4 sm:$0xff]   ;;  %v3747_v52 = vld [vmem:[#allocation4 + $0xc0] ss:$16 sps:$4 sm:$0xff]  }
  0xcb   :  { %1383 = vmatpush1.bf16.msra.mxu0 %v3663_v53  ;;  %1555 = vmatpush1.bf16.msra.mxu1 %v3666_v54  ;;  %v3750_v53 = vld [vmem:[#allocation4 + $0xc8] ss:$16 sps:$4 sm:$0xff]   ;;  %v3755_v54 = vld [vmem:[#allocation4 + $0xe4] ss:$16 sps:$4 sm:$0xff]  }
  0xcc   :  { %1384 = vmatprep.subr.bf16.mxu0 %v3671_v55  ;;  %1556 = vmatprep.subr.bf16.mxu1 %v3674_v56  ;;  %v3758_v55 = vld [vmem:[#allocation4 + $0xec] ss:$16 sps:$4 sm:$0xff]   ;;  %v3753_v56 = vld [vmem:[#allocation4 + $0xe0] ss:$16 sps:$4 sm:$0xff]  }
  0xcf   :  { %1385 = vmatpush1.bf16.msra.mxu0 %v3669_v57  ;;  %1557 = vmatpush1.bf16.msra.mxu1 %v3672_v58  ;;  %v3756_v57 = vld [vmem:[#allocation4 + $0xe8] ss:$16 sps:$4 sm:$0xff]   ;;  %v3761_v58 = vld [vmem:[#allocation4 + $0x104] ss:$16 sps:$4 sm:$0xff]  }
  0xd0   :  { %1386 = vmatprep.subr.bf16.mxu0 %v3677_v59  ;;  %1558 = vmatprep.subr.bf16.mxu1 %v3680_v60  ;;  %v3764_v59 = vld [vmem:[#allocation4 + $0x10c] ss:$16 sps:$4 sm:$0xff]   ;;  %v3759_v60 = vld [vmem:[#allocation4 + $0x100] ss:$16 sps:$4 sm:$0xff]  }
  0xd3   :  { %1387 = vmatpush1.bf16.msra.mxu0 %v3675_v61  ;;  %1559 = vmatpush1.bf16.msra.mxu1 %v3678_v62  ;;  %v3762_v61 = vld [vmem:[#allocation4 + $0x108] ss:$16 sps:$4 sm:$0xff]   ;;  %v3767_v62 = vld [vmem:[#allocation4 + $0x124] ss:$16 sps:$4 sm:$0xff]  }
  0xd4   :  { %1388 = vmatprep.subr.bf16.mxu0 %v3683_v63  ;;  %1560 = vmatprep.subr.bf16.mxu1 %v3686_v0  ;;  %v3770_v63 = vld [vmem:[#allocation4 + $0x12c] ss:$16 sps:$4 sm:$0xff]   ;;  %v3765_v0 = vld [vmem:[#allocation4 + $0x120] ss:$16 sps:$4 sm:$0xff]  }
  0xd7   :  { %1389 = vmatpush1.bf16.msra.mxu0 %v3681_v1  ;;  %1561 = vmatpush1.bf16.msra.mxu1 %v3684_v2  ;;  %v3768_v1 = vld [vmem:[#allocation4 + $0x128] ss:$16 sps:$4 sm:$0xff]   ;;  %v3773_v2 = vld [vmem:[#allocation4 + $0x144] ss:$16 sps:$4 sm:$0xff]  }
  0xd8   :  { %1390 = vmatprep.subr.bf16.mxu0 %v3689_v3  ;;  %1562 = vmatprep.subr.bf16.mxu1 %v3692_v4  ;;  %v3776_v3 = vld [vmem:[#allocation4 + $0x14c] ss:$16 sps:$4 sm:$0xff]   ;;  %v3771_v4 = vld [vmem:[#allocation4 + $0x140] ss:$16 sps:$4 sm:$0xff]  }
  0xdb   :  { %1391 = vmatpush1.bf16.msra.mxu0 %v3687_v5  ;;  %1563 = vmatpush1.bf16.msra.mxu1 %v3690_v6  ;;  %v3774_v5 = vld [vmem:[#allocation4 + $0x148] ss:$16 sps:$4 sm:$0xff]   ;;  %v3779_v6 = vld [vmem:[#allocation4 + $0x164] ss:$16 sps:$4 sm:$0xff]  }
  0xdc   :  { %1392 = vmatprep.subr.bf16.mxu0 %v3695_v7  ;;  %1564 = vmatprep.subr.bf16.mxu1 %v3698_v8  ;;  %v3782_v7 = vld [vmem:[#allocation4 + $0x16c] ss:$16 sps:$4 sm:$0xff]   ;;  %v3777_v8 = vld [vmem:[#allocation4 + $0x160] ss:$16 sps:$4 sm:$0xff]  }
  0xdf   :  { %1393 = vmatpush1.bf16.msra.mxu0 %v3693_v9  ;;  %1565 = vmatpush1.bf16.msra.mxu1 %v3696_v10  ;;  %v3780_v9 = vld [vmem:[#allocation4 + $0x168] ss:$16 sps:$4 sm:$0xff]   ;;  %v3785_v10 = vld [vmem:[#allocation4 + $0x184] ss:$16 sps:$4 sm:$0xff]  }
  0xe0   :  { %1394 = vmatprep.subr.bf16.mxu0 %v3701_v11  ;;  %1566 = vmatprep.subr.bf16.mxu1 %v3704_v12  ;;  %v3788_v11 = vld [vmem:[#allocation4 + $0x18c] ss:$16 sps:$4 sm:$0xff]   ;;  %v3783_v12 = vld [vmem:[#allocation4 + $0x180] ss:$16 sps:$4 sm:$0xff]  }
  0xe3   :  { %1395 = vmatpush1.bf16.msra.mxu0 %v3699_v13  ;;  %1567 = vmatpush1.bf16.msra.mxu1 %v3702_v14  ;;  %v3786_v13 = vld [vmem:[#allocation4 + $0x188] ss:$16 sps:$4 sm:$0xff]   ;;  %v3791_v14 = vld [vmem:[#allocation4 + $0x1a4] ss:$16 sps:$4 sm:$0xff]  }
  0xe4   :  { %1407 = vmatprep.subr.bf16.mxu0 %v3707_v17  ;;  %1579 = vmatprep.subr.bf16.mxu1 %v3710_v18  ;;  %v3792_v17 = vld [vmem:[#allocation4 + $0x1a8] ss:$16 sps:$4 sm:$0xff]   ;;  %v3797_v18 = vld [vmem:[#allocation4 + $0x1c4] ss:$16 sps:$4 sm:$0xff]  }
  0xe6   :  { %1397 = vmatmul.mubr.bf16.vlgmr.msra.gmra.mrb[0].mxu0 %v73_v21  ;;  %1569 = vmatmul.mubr.bf16.vlgmr.msra.gmra.mrb[0].mxu1 %v73_v21  ;;  %v3798_v21 = vld [vmem:[#allocation4 + $0x1c8] ss:$16 sps:$4 sm:$0xff]  }
  0xe7   :  { %1408 = vmatpush1.bf16.msra.mxu0 %v3705_v19  ;;  %1580 = vmatpush1.bf16.msra.mxu1 %v3708_v20  ;;  %v3800_v19 = vld [vmem:[#allocation4 + $0x1cc] ss:$16 sps:$4 sm:$0xff]   ;;  %v3795_v20 = vld [vmem:[#allocation4 + $0x1c0] ss:$16 sps:$4 sm:$0xff]  }
  0xe8   :  { %1439 = vmatprep.mubr.bf16.mxu0 %v3987_v24  ;;  %1611 = vmatprep.mubr.bf16.mxu1 %v3987_v24  ;;  %v3801_v24 = vld [vmem:[#allocation4 + $0x1e0] ss:$16 sps:$4 sm:$0xff]  }
  0xe9   :  { %2424 = vmatprep.subr.bf16.mxu0 %v3713_v22  ;;  %2510 = vmatprep.subr.bf16.mxu1 %v3716_v23  ;;  %v3803_v22 = vld [vmem:[#allocation4 + $0x1e4] ss:$16 sps:$4 sm:$0xff]   ;;  %v3806_v23 = vld [vmem:[#allocation4 + $0x1ec] ss:$16 sps:$4 sm:$0xff]  }
  0xf2   :  { %3157 = vmatmul.mubr.msk.bf16.vlgmr.msra.gmra.mrb[0].mxu0 %vm1274_vm0, %v75_v29  ;;  %3158 = vmatmul.mubr.msk.bf16.vlgmr.msra.gmra.mrb[0].mxu1 %vm1274_vm0, %v75_v29 }
  0xf3   :  { %2425 = vmatpush1.bf16.msra.mxu0 %v3711_v27  ;;  %2511 = vmatpush1.bf16.msra.mxu1 %v3714_v28  ;;  %v3812_v27 = vld [vmem:[#allocation4 + $0x20c] ss:$16 sps:$4 sm:$0xff]   ;;  %v274_v28 = vlaneseq }
  0xf4   :  { %2426 = vmatprep.subr.bf16.mxu0 %v3719_v30  ;;  %2512 = vmatprep.subr.bf16.mxu1 %v3722_v31 }
  0xf5   :  { %v4096_v29 = vshrl.u32 %v274_v28, 7  ;;  %v3846_v28 = vld [vmem:[#allocation4 + $0x2c8] ss:$16 sps:$4 sm:$0xff]  }
  0xf7   :  { %2427 = vmatpush1.bf16.msra.mxu0 %v3717_v32  ;;  %2513 = vmatpush1.bf16.msra.mxu1 %v3720_v33  ;;  %v276_v30 = vsub.s32 0, %v4096_v29  ;;  %v284_v31 = vsub.s32 2, %v4096_v29  ;;  %v272_v32 = vld [vmem:[%s4235_s2] sm:$0xf]  ;;  %v280_v33 = vsub.s32 1, %v4096_v29 }
  0xf8   :  { %2428 = vmatprep.subr.bf16.mxu0 %v3725_v34  ;;  %2514 = vmatprep.subr.bf16.mxu1 %v3728_v35  ;;  %v288_v34 = vsub.s32 3, %v4096_v29 }
  0xf9   :  { %v277_v35 = vrot.slane %v272_v32, %v276_v30 }
  0xfb   :  { %2429 = vmatpush1.bf16.msra.mxu0 %v3723_v36  ;;  %2515 = vmatpush1.bf16.msra.mxu1 %v3726_v37  ;;  %v285_v36 = vrot.slane %v272_v32, %v284_v31  ;;  %v281_v37 = vrot.slane %v272_v32, %v280_v33 }
  0xfc   :  { %2430 = vmatprep.subr.bf16.mxu0 %v3731_v38  ;;  %2516 = vmatprep.subr.bf16.mxu1 %v3734_v39  ;;  %v289_v38 = vrot.slane %v272_v32, %v288_v34  ;;  %v3851_v32 = vld [vmem:[#allocation4 + $0x2e4] ss:$16 sps:$4 sm:$0xff]  }
  0xff   :  { %2431 = vmatpush1.bf16.msra.mxu0 %v3729_v40  ;;  %2517 = vmatpush1.bf16.msra.mxu1 %v3732_v41 }
 0x100   :  { %2432 = vmatprep.subr.bf16.mxu0 %v3737_v42  ;;  %2518 = vmatprep.subr.bf16.mxu1 %v3740_v43 }
 0x103   :  { %2433 = vmatpush1.bf16.msra.mxu0 %v3735_v44  ;;  %2519 = vmatpush1.bf16.msra.mxu1 %v3738_v45 }
 0x104   :  { %2434 = vmatprep.subr.bf16.mxu0 %v3743_v46  ;;  %2520 = vmatprep.subr.bf16.mxu1 %v3746_v47 }
 0x107   :  { %2435 = vmatpush1.bf16.msra.mxu0 %v3741_v48  ;;  %2521 = vmatpush1.bf16.msra.mxu1 %v3744_v49 }
 0x108   :  { %2436 = vmatprep.subr.bf16.mxu0 %v3749_v50  ;;  %2522 = vmatprep.subr.bf16.mxu1 %v3752_v51 }
 0x10b   :  { %2437 = vmatpush1.bf16.msra.mxu0 %v3747_v52  ;;  %2523 = vmatpush1.bf16.msra.mxu1 %v3750_v53 }
 0x10c   :  { %2438 = vmatprep.subr.bf16.mxu0 %v3755_v54  ;;  %2524 = vmatprep.subr.bf16.mxu1 %v3758_v55 }
 0x10f   :  { %2439 = vmatpush1.bf16.msra.mxu0 %v3753_v56  ;;  %2525 = vmatpush1.bf16.msra.mxu1 %v3756_v57 }
 0x110   :  { %2440 = vmatprep.subr.bf16.mxu0 %v3761_v58  ;;  %2526 = vmatprep.subr.bf16.mxu1 %v3764_v59 }
 0x113   :  { %2441 = vmatpush1.bf16.msra.mxu0 %v3759_v60  ;;  %2527 = vmatpush1.bf16.msra.mxu1 %v3762_v61 }
 0x114   :  { %2442 = vmatprep.subr.bf16.mxu0 %v3767_v62  ;;  %2528 = vmatprep.subr.bf16.mxu1 %v3770_v63 }
 0x117   :  { %2443 = vmatpush1.bf16.msra.mxu0 %v3765_v0  ;;  %2529 = vmatpush1.bf16.msra.mxu1 %v3768_v1 }
 0x118   :  { %2444 = vmatprep.subr.bf16.mxu0 %v3773_v2  ;;  %2530 = vmatprep.subr.bf16.mxu1 %v3776_v3  ;;  %v3807_v3 = vld [vmem:[#allocation4 + $0x200] ss:$16 sps:$4 sm:$0xff]  }
 0x11b   :  { %2445 = vmatpush1.bf16.msra.mxu0 %v3771_v4  ;;  %2531 = vmatpush1.bf16.msra.mxu1 %v3774_v5  ;;  %v3810_v4 = vld [vmem:[#allocation4 + $0x208] ss:$16 sps:$4 sm:$0xff]   ;;  %v3815_v5 = vld [vmem:[#allocation4 + $0x224] ss:$16 sps:$4 sm:$0xff]  }
 0x11c   :  { %2446 = vmatprep.subr.bf16.mxu0 %v3779_v6  ;;  %2532 = vmatprep.subr.bf16.mxu1 %v3782_v7  ;;  %v3818_v6 = vld [vmem:[#allocation4 + $0x22c] ss:$16 sps:$4 sm:$0xff]   ;;  %v3813_v7 = vld [vmem:[#allocation4 + $0x220] ss:$16 sps:$4 sm:$0xff]  }
 0x11f   :  { %2447 = vmatpush1.bf16.msra.mxu0 %v3777_v8  ;;  %2533 = vmatpush1.bf16.msra.mxu1 %v3780_v9  ;;  %v3816_v8 = vld [vmem:[#allocation4 + $0x228] ss:$16 sps:$4 sm:$0xff]   ;;  %v3821_v9 = vld [vmem:[#allocation4 + $0x244] ss:$16 sps:$4 sm:$0xff]  }
 0x120   :  { %2448 = vmatprep.subr.bf16.mxu0 %v3785_v10  ;;  %2534 = vmatprep.subr.bf16.mxu1 %v3788_v11  ;;  %v3824_v10 = vld [vmem:[#allocation4 + $0x24c] ss:$16 sps:$4 sm:$0xff]   ;;  %v3819_v11 = vld [vmem:[#allocation4 + $0x240] ss:$16 sps:$4 sm:$0xff]  }
 0x123   :  { %2449 = vmatpush1.bf16.msra.mxu0 %v3783_v12  ;;  %2535 = vmatpush1.bf16.msra.mxu1 %v3786_v13  ;;  %v3822_v12 = vld [vmem:[#allocation4 + $0x248] ss:$16 sps:$4 sm:$0xff]   ;;  %v3827_v13 = vld [vmem:[#allocation4 + $0x264] ss:$16 sps:$4 sm:$0xff]  }
 0x124   :  { %2450 = vmatprep.subr.bf16.mxu0 %v3791_v14  ;;  %2536 = vmatprep.subr.bf16.mxu1 %v3794_v15  ;;  %v3830_v14 = vld [vmem:[#allocation4 + $0x26c] ss:$16 sps:$4 sm:$0xff]   ;;  %v3825_v15 = vld [vmem:[#allocation4 + $0x260] ss:$16 sps:$4 sm:$0xff]  }
 0x127   :  { %2451 = vmatpush1.bf16.msra.mxu0 %v3789_v16  ;;  %2537 = vmatpush1.bf16.msra.mxu1 %v3792_v17  ;;  %v3828_v16 = vld [vmem:[#allocation4 + $0x268] ss:$16 sps:$4 sm:$0xff]   ;;  %v3833_v17 = vld [vmem:[#allocation4 + $0x284] ss:$16 sps:$4 sm:$0xff]  }
 0x128   :  { %2452 = vmatprep.subr.bf16.mxu0 %v3797_v18  ;;  %2538 = vmatprep.subr.bf16.mxu1 %v3800_v19  ;;  %v3836_v18 = vld [vmem:[#allocation4 + $0x28c] ss:$16 sps:$4 sm:$0xff]   ;;  %v3831_v19 = vld [vmem:[#allocation4 + $0x280] ss:$16 sps:$4 sm:$0xff]  }
 0x12b   :  { %2453 = vmatpush1.bf16.msra.mxu0 %v3795_v20  ;;  %2539 = vmatpush1.bf16.msra.mxu1 %v3798_v21  ;;  %v3834_v20 = vld [vmem:[#allocation4 + $0x288] ss:$16 sps:$4 sm:$0xff]   ;;  %v3839_v21 = vld [vmem:[#allocation4 + $0x2a4] ss:$16 sps:$4 sm:$0xff]  }
 0x12c   :  { %2454 = vmatprep.subr.bf16.mxu0 %v3803_v22  ;;  %2540 = vmatprep.subr.bf16.mxu1 %v3806_v23  ;;  %v3842_v22 = vld [vmem:[#allocation4 + $0x2ac] ss:$16 sps:$4 sm:$0xff]   ;;  %v3837_v23 = vld [vmem:[#allocation4 + $0x2a0] ss:$16 sps:$4 sm:$0xff]  }
 0x12f   :  { %2455 = vmatpush1.bf16.msra.mxu0 %v3801_v24  ;;  %2541 = vmatpush1.bf16.msra.mxu1 %v3804_v25  ;;  %v3840_v24 = vld [vmem:[#allocation4 + $0x2a8] ss:$16 sps:$4 sm:$0xff]   ;;  %v3845_v25 = vld [vmem:[#allocation4 + $0x2c4] ss:$16 sps:$4 sm:$0xff]  }
 0x130   :  { %2467 = vmatprep.subr.bf16.mxu0 %v3809_v26  ;;  %2553 = vmatprep.subr.bf16.mxu1 %v3812_v27  ;;  %v3848_v26 = vld [vmem:[#allocation4 + $0x2cc] ss:$16 sps:$4 sm:$0xff]   ;;  %v3843_v27 = vld [vmem:[#allocation4 + $0x2c0] ss:$16 sps:$4 sm:$0xff]  }
 0x1c5   :  { %v1441_v39 = vpop.f32.mrb[0].mxu0  ;;  %v1613_v40 = vpop.f32.mrb[0].mxu1 }
 0x1c6   :  { %v3364_v41 = vadd.f32 %v1441_v39, %v277_v35  ;;  %v3368_v42 = vadd.f32 %v1613_v40, %v285_v36  ;;  %v1443_v43 = vpop.f32.mrb[1].mxu0  ;;  %v1615_v44 = vpop.f32.mrb[1].mxu1  ;;  %v3860_v39 = vld [vmem:[#allocation4 + $0x30c] ss:$16 sps:$4 sm:$0xff]   ;;  %v3855_v40 = vld [vmem:[#allocation4 + $0x300] ss:$16 sps:$4 sm:$0xff]  }
 0x1c7   :  { %v3365_v45 = vadd.f32 %v1443_v43, %v281_v37  ;;  %v3369_v46 = vadd.f32 %v1615_v44, %v289_v38  ;;  %v1445_v47 = vpop.f32.mrb[2].mxu0  ;;  %v1617_v48 = vpop.f32.mrb[2].mxu1  ;;  %v3866_v43 = vld [vmem:[#allocation4 + $0x32c] ss:$16 sps:$4 sm:$0xff]   ;;  %v3861_v44 = vld [vmem:[#allocation4 + $0x320] ss:$16 sps:$4 sm:$0xff]  }
 0x1c8   :  { %v3366_v49 = vadd.f32 %v1445_v47, %v277_v35  ;;  %v3370_v50 = vadd.f32 %v1617_v48, %v285_v36  ;;  %v1447_v51 = vpop.f32.mrb[3].mxu0  ;;  %v1619_v52 = vpop.f32.mrb[3].mxu1  ;;  %v1622_v55 = vmax.f32 %v3364_v41, 0.0  ;;  %v1624_v56 = vmax.f32 %v3368_v42, 0.0  ;;  %v3854_v35 = vld [vmem:[#allocation4 + $0x2ec] ss:$16 sps:$4 sm:$0xff]  }
 0x1c9   :  { %v3367_v53 = vadd.f32 %v1447_v51, %v281_v37  ;;  %v3371_v54 = vadd.f32 %v1619_v52, %v289_v38  ;;  %v1623_v59 = vmax.f32 %v3365_v45, 0.0  ;;  %v1625_v60 = vmax.f32 %v3369_v46, 0.0  ;;  %v3849_v36 = vld [vmem:[#allocation4 + $0x2e0] ss:$16 sps:$4 sm:$0xff]   ;;  %v3852_v37 = vld [vmem:[#allocation4 + $0x2e8] ss:$16 sps:$4 sm:$0xff]  }
 0x1ca   :  { %v1626_v57 = vmax.f32 %v3366_v49, 0.0  ;;  %v1628_v58 = vmax.f32 %v3370_v50, 0.0  ;;  %v3857_v38 = vld [vmem:[#allocation4 + $0x304] ss:$16 sps:$4 sm:$0xff]   ;;  %v3858_v41 = vld [vmem:[#allocation4 + $0x308] ss:$16 sps:$4 sm:$0xff]  }
 0x1cb   :  { %v1627_v61 = vmax.f32 %v3367_v53, 0.0  ;;  %v1629_v62 = vmax.f32 %v3371_v54, 0.0  ;;  %v3863_v42 = vld [vmem:[#allocation4 + $0x324] ss:$16 sps:$4 sm:$0xff]   ;;  %v3864_v45 = vld [vmem:[#allocation4 + $0x328] ss:$16 sps:$4 sm:$0xff]  }
 0x1cc   :  { %v1630_v63 = vpack.c.bf16 %v1626_v57, %v1622_v55  ;;  %v4113_v0 = vpack.c.bf16 %v1628_v58, %v1624_v56  ;;  %v3869_v46 = vld [vmem:[#allocation4 + $0x344] ss:$16 sps:$4 sm:$0xff]   ;;  %v3872_v47 = vld [vmem:[#allocation4 + $0x34c] ss:$16 sps:$4 sm:$0xff]   ;;  %v3867_v48 = vld [vmem:[#allocation4 + $0x340] ss:$16 sps:$4 sm:$0xff]  }
 0x1cd   :  { %v1631_v1 = vpack.c.bf16 %v1627_v61, %v1623_v59  ;;  %v1633_v2 = vpack.c.bf16 %v1629_v62, %v1625_v60  ;;  %v3870_v49 = vld [vmem:[#allocation4 + $0x348] ss:$16 sps:$4 sm:$0xff]   ;;  %v3875_v50 = vld [vmem:[#allocation4 + $0x364] ss:$16 sps:$4 sm:$0xff]   ;;  %v3878_v51 = vld [vmem:[#allocation4 + $0x36c] ss:$16 sps:$4 sm:$0xff]  }
 0x1ce   :  { %v3873_v52 = vld [vmem:[#allocation4 + $0x360] ss:$16 sps:$4 sm:$0xff]   ;;  %v3876_v53 = vld [vmem:[#allocation4 + $0x368] ss:$16 sps:$4 sm:$0xff]   ;;  %v3881_v54 = vld [vmem:[#allocation4 + $0x384] ss:$16 sps:$4 sm:$0xff]  }
 0x1cf   :  { %2456 = vmatprep.mubr.bf16.mxu0 %v1631_v1  ;;  %2542 = vmatprep.mubr.bf16.mxu1 %v1631_v1  ;;  %v3884_v55 = vld [vmem:[#allocation4 + $0x38c] ss:$16 sps:$4 sm:$0xff]   ;;  %v3879_v56 = vld [vmem:[#allocation4 + $0x380] ss:$16 sps:$4 sm:$0xff]   ;;  %v3882_v57 = vld [vmem:[#allocation4 + $0x388] ss:$16 sps:$4 sm:$0xff]  }
 0x1d0   :  { %2457 = vmatmul.mubr.bf16.vlgmr.msra.gmra.mrb[4].mxu0 %v1630_v63  ;;  %2543 = vmatmul.mubr.bf16.vlgmr.msra.gmra.mrb[4].mxu1 %v1630_v63  ;;  %v3887_v58 = vld [vmem:[#allocation4 + $0x3a4] ss:$16 sps:$4 sm:$0xff]   ;;  %v3890_v59 = vld [vmem:[#allocation4 + $0x3ac] ss:$16 sps:$4 sm:$0xff]   ;;  %v3885_v60 = vld [vmem:[#allocation4 + $0x3a0] ss:$16 sps:$4 sm:$0xff]  }
 0x1d1   :  { %2468 = vmatpush1.bf16.msra.mxu0 %v3807_v3  ;;  %2554 = vmatpush1.bf16.msra.mxu1 %v3810_v4  ;;  %v3888_v61 = vld [vmem:[#allocation4 + $0x3a8] ss:$16 sps:$4 sm:$0xff]   ;;  %v3893_v62 = vld [vmem:[#allocation4 + $0x3c4] ss:$16 sps:$4 sm:$0xff]   ;;  %v3896_v63 = vld [vmem:[#allocation4 + $0x3cc] ss:$16 sps:$4 sm:$0xff]  }
 0x1d2   :  { %2499 = vmatprep.mubr.bf16.mxu0 %v1633_v2  ;;  %2585 = vmatprep.mubr.bf16.mxu1 %v1633_v2  ;;  %v3891_v1 = vld [vmem:[#allocation4 + $0x3c0] ss:$16 sps:$4 sm:$0xff]   ;;  %v3894_v2 = vld [vmem:[#allocation4 + $0x3c8] ss:$16 sps:$4 sm:$0xff]   ;;  %v3899_v3 = vld [vmem:[#allocation4 + $0x3e4] ss:$16 sps:$4 sm:$0xff]  }
 0x1d3   :  { %2469 = vmatprep.subr.bf16.mxu0 %v3815_v5  ;;  %2555 = vmatprep.subr.bf16.mxu1 %v3818_v6  ;;  %v3902_v4 = vld [vmem:[#allocation4 + $0x3ec] ss:$16 sps:$4 sm:$0xff]   ;;  %v3897_v5 = vld [vmem:[#allocation4 + $0x3e0] ss:$16 sps:$4 sm:$0xff]   ;;  %v3900_v6 = vld [vmem:[#allocation4 + $0x3e8] ss:$16 sps:$4 sm:$0xff]  }
 0x1d5   :  { %2470 = vmatpush1.bf16.msra.mxu0 %v3813_v7  ;;  %2556 = vmatpush1.bf16.msra.mxu1 %v3816_v8  ;;  %v3903_v7 = vld [vmem:[%s4238_s5 + $0x40] sm:$0xff]  }
 0x1d6   :  { %2471 = vmatprep.subr.bf16.mxu0 %v3821_v9  ;;  %2557 = vmatprep.subr.bf16.mxu1 %v3824_v10  ;;  %v3904_v8 = vld [vmem:[%s4238_s5 + $0xc0] sm:$0xff]  }
 0x1d7   :  { %v3905_v9 = vld [vmem:[%s4238_s5] sm:$0xff]  }
 0x1d8   :  { %v3906_v10 = vld [vmem:[%s4238_s5 + $0x80] sm:$0xff]  }
 0x1d9   :  { %2472 = vmatpush1.bf16.msra.mxu0 %v3819_v11  ;;  %2558 = vmatpush1.bf16.msra.mxu1 %v3822_v12  ;;  %v3907_v11 = vld [vmem:[%s4238_s5 + $0x48] sm:$0xff]  }
 0x1da   :  { %2473 = vmatprep.subr.bf16.mxu0 %v3827_v13  ;;  %2559 = vmatprep.subr.bf16.mxu1 %v3830_v14  ;;  %v3908_v12 = vld [vmem:[%s4238_s5 + $0xc8] sm:$0xff]  }
 0x1db   :  { %v3909_v13 = vld [vmem:[%s4238_s5 + $0x8] sm:$0xff]  }
 0x1dc   :  { %v3910_v14 = vld [vmem:[%s4238_s5 + $0x88] sm:$0xff]  }
 0x1dd   :  { %2474 = vmatpush1.bf16.msra.mxu0 %v3825_v15  ;;  %2560 = vmatpush1.bf16.msra.mxu1 %v3828_v16  ;;  %v3911_v15 = vld [vmem:[%s4238_s5 + $0x50] sm:$0xff]  }
 0x1de   :  { %2475 = vmatprep.subr.bf16.mxu0 %v3833_v17  ;;  %2561 = vmatprep.subr.bf16.mxu1 %v3836_v18  ;;  %v3913_v16 = vld [vmem:[%s4238_s5 + $0x10] sm:$0xff]   ;;  %v3915_v18 = vld [vmem:[%s4238_s5 + $0x58] sm:$0xff]  }
 0x1df   :  { %v3914_v17 = vld [vmem:[%s4238_s5 + $0x90] sm:$0xff]  }
 0x1e1   :  { %2476 = vmatpush1.bf16.msra.mxu0 %v3831_v19  ;;  %2562 = vmatpush1.bf16.msra.mxu1 %v3834_v20  ;;  %v3916_v19 = vld [vmem:[%s4238_s5 + $0xd8] sm:$0xff]  }
 0x1e2   :  { %2477 = vmatprep.subr.bf16.mxu0 %v3839_v21  ;;  %2563 = vmatprep.subr.bf16.mxu1 %v3842_v22  ;;  %v3917_v20 = vld [vmem:[%s4238_s5 + $0x18] sm:$0xff]   ;;  %v3919_v22 = vld [vmem:[%s4238_s5 + $0x60] sm:$0xff]  }
 0x1e3   :  { %v3918_v21 = vld [vmem:[%s4238_s5 + $0x98] sm:$0xff]  }
 0x1e5   :  { %2478 = vmatpush1.bf16.msra.mxu0 %v3837_v23  ;;  %2564 = vmatpush1.bf16.msra.mxu1 %v3840_v24  ;;  %v3920_v23 = vld [vmem:[%s4238_s5 + $0xe0] sm:$0xff]  }
 0x1e6   :  { %2479 = vmatprep.subr.bf16.mxu0 %v3845_v25  ;;  %2565 = vmatprep.subr.bf16.mxu1 %v3848_v26  ;;  %v3921_v24 = vld [vmem:[%s4238_s5 + $0x20] sm:$0xff]   ;;  %v3923_v26 = vld [vmem:[%s4238_s5 + $0x68] sm:$0xff]  }
 0x1e7   :  { %v3922_v25 = vld [vmem:[%s4238_s5 + $0xa0] sm:$0xff]  }
 0x1e9   :  { %2480 = vmatpush1.bf16.msra.mxu0 %v3843_v27  ;;  %2566 = vmatpush1.bf16.msra.mxu1 %v3846_v28  ;;  %v3924_v27 = vld [vmem:[%s4238_s5 + $0xe8] sm:$0xff]  }
 0x1ea   :  { %2481 = vmatprep.subr.bf16.mxu0 %v3851_v32  ;;  %2567 = vmatprep.subr.bf16.mxu1 %v3854_v35  ;;  %v3925_v28 = vld [vmem:[%s4238_s5 + $0x28] sm:$0xff]   ;;  %v3927_v35 = vld [vmem:[%s4238_s5 + $0x70] sm:$0xff]  }
 0x1eb   :  { %v3926_v32 = vld [vmem:[%s4238_s5 + $0xa8] sm:$0xff]  }
 0x1ed   :  { %2482 = vmatpush1.bf16.msra.mxu0 %v3849_v36  ;;  %2568 = vmatpush1.bf16.msra.mxu1 %v3852_v37  ;;  %v3928_v36 = vld [vmem:[%s4238_s5 + $0xf0] sm:$0xff]  }
 0x1ee   :  { %2483 = vmatprep.subr.bf16.mxu0 %v3857_v38  ;;  %2569 = vmatprep.subr.bf16.mxu1 %v3860_v39  ;;  %v3929_v37 = vld [vmem:[%s4238_s5 + $0x30] sm:$0xff]   ;;  %v3931_v39 = vld [vmem:[%s4238_s5 + $0x78] sm:$0xff]  }
 0x1ef   :  { %v3930_v38 = vld [vmem:[%s4238_s5 + $0xb0] sm:$0xff]  }
 0x1f1   :  { %2484 = vmatpush1.bf16.msra.mxu0 %v3855_v40  ;;  %2570 = vmatpush1.bf16.msra.mxu1 %v3858_v41  ;;  %v3932_v40 = vld [vmem:[%s4238_s5 + $0xf8] sm:$0xff]  }
 0x1f2   :  { %2485 = vmatprep.subr.bf16.mxu0 %v3863_v42  ;;  %2571 = vmatprep.subr.bf16.mxu1 %v3866_v43  ;;  %v3933_v41 = vld [vmem:[%s4238_s5 + $0x38] sm:$0xff]   ;;  %v1762_v43 = vld [vmem:[%s4237_s4] sm:$0xf] }
 0x1f3   :  { %v3934_v42 = vld [vmem:[%s4238_s5 + $0xb8] sm:$0xff]  }
 0x1f5   :  { %2486 = vmatpush1.bf16.msra.mxu0 %v3861_v44  ;;  %2572 = vmatpush1.bf16.msra.mxu1 %v3864_v45  ;;  %v1767_v44 = vrot.slane %v1762_v43, %v276_v30  ;;  %v1775_v45 = vrot.slane %v1762_v43, %v284_v31 }
 0x1f6   :  { %2487 = vmatprep.subr.bf16.mxu0 %v3869_v46  ;;  %2573 = vmatprep.subr.bf16.mxu1 %v3872_v47  ;;  %v1771_v46 = vrot.slane %v1762_v43, %v280_v33  ;;  %v1779_v47 = vrot.slane %v1762_v43, %v288_v34 }
 0x1f9   :  { %2488 = vmatpush1.bf16.msra.mxu0 %v3867_v48  ;;  %2574 = vmatpush1.bf16.msra.mxu1 %v3870_v49 }
 0x1fa   :  { %2489 = vmatprep.subr.bf16.mxu0 %v3875_v50  ;;  %2575 = vmatprep.subr.bf16.mxu1 %v3878_v51 }
 0x1fd   :  { %2490 = vmatpush1.bf16.msra.mxu0 %v3873_v52  ;;  %2576 = vmatpush1.bf16.msra.mxu1 %v3876_v53 }
 0x1fe   :  { %2491 = vmatprep.subr.bf16.mxu0 %v3881_v54  ;;  %2577 = vmatprep.subr.bf16.mxu1 %v3884_v55 }
 0x201   :  { %2492 = vmatpush1.bf16.msra.mxu0 %v3879_v56  ;;  %2578 = vmatpush1.bf16.msra.mxu1 %v3882_v57 }
 0x202   :  { %2493 = vmatprep.subr.bf16.mxu0 %v3887_v58  ;;  %2579 = vmatprep.subr.bf16.mxu1 %v3890_v59 }
 0x205   :  { %2494 = vmatpush1.bf16.msra.mxu0 %v3885_v60  ;;  %2580 = vmatpush1.bf16.msra.mxu1 %v3888_v61 }
 0x206   :  { %2495 = vmatprep.subr.bf16.mxu0 %v3893_v62  ;;  %2581 = vmatprep.subr.bf16.mxu1 %v3896_v63 }
 0x209   :  { %2496 = vmatpush1.bf16.msra.mxu0 %v3891_v1  ;;  %2582 = vmatpush1.bf16.msra.mxu1 %v3894_v2 }
 0x20a   :  { %2497 = vmatprep.subr.bf16.mxu0 %v3899_v3  ;;  %2583 = vmatprep.subr.bf16.mxu1 %v3902_v4 }
 0x20d   :  { %2498 = vmatpush1.bf16.msra.mxu0 %v3897_v5  ;;  %2584 = vmatpush1.bf16.msra.mxu1 %v3900_v6 }
 0x20e   :  { %3320 = vmatprep.subr.bf16.mxu0 %v3903_v7  ;;  %3342 = vmatprep.subr.bf16.mxu1 %v3904_v8 }
 0x210   :  { %2500 = vmatmul.mubr.bf16.vlgmr.msra.gmra.mrb[4].mxu0 %v4113_v0  ;;  %2586 = vmatmul.mubr.bf16.vlgmr.msra.gmra.mrb[4].mxu1 %v4113_v0  ;;  %v3912_v0 = vld [vmem:[%s4238_s5 + $0xd0] sm:$0xff]  }
 0x211   :  { %3321 = vmatpush3.bf16.msra.mxu0 %v3905_v9  ;;  %3343 = vmatpush3.bf16.msra.mxu1 %v3906_v10  ;;  %v3287_v10 = vld [vmem:[%s4239_s6] ss:$0 sm:$0xff] }
 0x212   :  { %3322 = vmatprep.subr.bf16.mxu0 %v3907_v11  ;;  %3344 = vmatprep.subr.bf16.mxu1 %v3908_v12 }
 0x215   :  { %3323 = vmatpush3.bf16.msra.mxu0 %v3909_v13  ;;  %3345 = vmatpush3.bf16.msra.mxu1 %v3910_v14 }
 0x216   :  { %3324 = vmatprep.subr.bf16.mxu0 %v3911_v15  ;;  %3346 = vmatprep.subr.bf16.mxu1 %v3912_v0 }
 0x219   :  { %3325 = vmatpush3.bf16.msra.mxu0 %v3913_v16  ;;  %3347 = vmatpush3.bf16.msra.mxu1 %v3914_v17 }
 0x21a   :  { %3326 = vmatprep.subr.bf16.mxu0 %v3915_v18  ;;  %3348 = vmatprep.subr.bf16.mxu1 %v3916_v19 }
 0x21d   :  { %3327 = vmatpush3.bf16.msra.mxu0 %v3917_v20  ;;  %3349 = vmatpush3.bf16.msra.mxu1 %v3918_v21 }
 0x21e   :  { %3328 = vmatprep.subr.bf16.mxu0 %v3919_v22  ;;  %3350 = vmatprep.subr.bf16.mxu1 %v3920_v23 }
 0x221   :  { %3329 = vmatpush3.bf16.msra.mxu0 %v3921_v24  ;;  %3351 = vmatpush3.bf16.msra.mxu1 %v3922_v25 }
 0x222   :  { %3330 = vmatprep.subr.bf16.mxu0 %v3923_v26  ;;  %3352 = vmatprep.subr.bf16.mxu1 %v3924_v27 }
 0x225   :  { %3331 = vmatpush3.bf16.msra.mxu0 %v3925_v28  ;;  %3353 = vmatpush3.bf16.msra.mxu1 %v3926_v32 }
 0x226   :  { %3332 = vmatprep.subr.bf16.mxu0 %v3927_v35  ;;  %3354 = vmatprep.subr.bf16.mxu1 %v3928_v36 }
 0x229   :  { %3333 = vmatpush3.bf16.msra.mxu0 %v3929_v37  ;;  %3355 = vmatpush3.bf16.msra.mxu1 %v3930_v38 }
 0x22a   :  { %3334 = vmatprep.subr.bf16.mxu0 %v3931_v39  ;;  %3356 = vmatprep.subr.bf16.mxu1 %v3932_v40 }
 0x22d   :  { %3335 = vmatpush3.bf16.msra.mxu0 %v3933_v41  ;;  %3357 = vmatpush3.bf16.msra.mxu1 %v3934_v42 }
 0x2e3   :  { %v2501_v48 = vpop.f32.mrb[4].mxu0  ;;  %v2587_v49 = vpop.f32.mrb[4].mxu1 }
 0x2e4   :  { %v3372_v50 = vadd.f32 %v2501_v48, %v1767_v44  ;;  %v3376_v51 = vadd.f32 %v2587_v49, %v1775_v45  ;;  %v2503_v52 = vpop.f32.mrb[5].mxu0  ;;  %v2589_v53 = vpop.f32.mrb[5].mxu1 }
 0x2e5   :  { %v3373_v54 = vadd.f32 %v2503_v52, %v1771_v46  ;;  %v3377_v55 = vadd.f32 %v2589_v53, %v1779_v47  ;;  %v2505_v56 = vpop.f32.mrb[6].mxu0  ;;  %v2591_v57 = vpop.f32.mrb[6].mxu1 }
 0x2e6   :  { %v3374_v30 = vadd.f32 %v2505_v56, %v1767_v44  ;;  %v3378_v58 = vadd.f32 %v2591_v57, %v1775_v45  ;;  %v2507_v59 = vpop.f32.mrb[7].mxu0  ;;  %v2593_v31 = vpop.f32.mrb[7].mxu1  ;;  %v2596_v33 = vmax.f32 %v3372_v50, 0.0  ;;  %v2598_v62 = vmax.f32 %v3376_v51, 0.0 }
 0x2e7   :  { %v3375_v60 = vadd.f32 %v2507_v59, %v1771_v46  ;;  %v3379_v61 = vadd.f32 %v2593_v31, %v1779_v47  ;;  %v2597_v63 = vmax.f32 %v3373_v54, 0.0  ;;  %v2599_v1 = vmax.f32 %v3377_v55, 0.0 }
 0x2e8   :  { %v2600_v29 = vmax.f32 %v3374_v30, 0.0  ;;  %v2602_v34 = vmax.f32 %v3378_v58, 0.0 }
 0x2e9   :  { %v2601_v2 = vmax.f32 %v3375_v60, 0.0  ;;  %v2603_v3 = vmax.f32 %v3379_v61, 0.0 }
 0x2ea   :  { %v2604_v4 = vpack.c.bf16 %v2600_v29, %v2596_v33  ;;  %v2606_v5 = vpack.c.bf16 %v2602_v34, %v2598_v62 }
 0x2eb   :  { %v2605_v6 = vpack.c.bf16 %v2601_v2, %v2597_v63  ;;  %v2607_v7 = vpack.c.bf16 %v2603_v3, %v2599_v1 }
 0x2ed   :  { %2903 = vmatprep.mubr.bf16.mxu0 %v2605_v6  ;;  %2944 = vmatprep.mubr.bf16.mxu1 %v2607_v7 }
 0x2ee   :  { %2904 = vmatmul.mubr.bf16.vlgmr.msra.gmra.mrb[8].mxu0 %v2604_v4  ;;  %2945 = vmatmul.mubr.bf16.vlgmr.msra.gmra.mrb[8].mxu1 %v2606_v5 }
 0x3c1   :  { %v3336_v8 = vpop.f32.mrb[8].mxu0  ;;  %v3358_v9 = vpop.f32.mrb[8].mxu1 }
 0x3c2   :  { %v3337_v11 = vpop.f32.mrb[9].mxu0  ;;  %v3359_v12 = vpop.f32.mrb[9].mxu1 }
 0x3c3   :  { %v3338_v13 = vadd.f32 %v3337_v11, %v3336_v8  ;;  %v3360_v14 = vadd.f32 %v3359_v12, %v3358_v9  ;;  %v3339_v15 = vpop.f32.mrb[10].mxu0  ;;  %v3361_v0 = vpop.f32.mrb[10].mxu1 }
 0x3c4   :  { %v3340_v16 = vpop.f32.mrb[11].mxu0  ;;  %v3362_v17 = vpop.f32.mrb[11].mxu1 }
 0x3c5   :  { %v2906_v18 = vadd.f32 %v3338_v13, %v3287_v10  ;;  %v3341_v19 = vadd.f32 %v3340_v16, %v3339_v15  ;;  %v3363_v20 = vadd.f32 %v3362_v17, %v3361_v0 }
 0x3c7   :  { %v2947_v21 = vadd.f32 %v3360_v14, %v2906_v18  ;;  %v2909_v22 = vadd.f32 %v3341_v19, %v3287_v10 }
 0x3c9   :  { %2953 = vst [vmem:[%s4240_s7] sm:$0xff] %v2947_v21  ;;  %v2950_v23 = vadd.f32 %v3363_v20, %v2909_v22 }
 0x3cb   :  { %2954 = vst [vmem:[%s4240_s7 + $0x8] sm:$0xff] %v2950_v23 }
 0x3cc   :  { %2959 = vsyncpa [#allocation3], 1 }
 0x3cd   :  { %2960 = vsyncpa [#allocation5], 1 }

</bundles_post_ra>
